<compile_context>
chip_gen: v6e
topology: v6e:2x2x1
jax: 0.10.0
libtpu: 0.0.40
codegen_flags: <defaults>
</compile_context>

<pallas_src>
import numpy as np
import jax
import jax.numpy as jnp
from jax import lax
from jax.experimental import pallas as pl
from jax.experimental.pallas import tpu as pltpu


# ---------------------------------------------------------------------------
# Fused kernel: one grid step = `images_per_step` images, everything in VMEM.
# Ref order: x, G_cat, b_dec, [B_l_stk, b_l]*nh, Sel_cat, B_tail_stk, b_tail, out
# ---------------------------------------------------------------------------
def _make_encoder_kernel(nh, H, R):
    # R = images_per_step * H rows per slab; image boundaries at r % H == 0.
    def kernel(*refs):
        f32 = jnp.float32
        bf16 = jnp.bfloat16
        x_ref, g_ref, bd_ref = refs[0:3]
        pos = 3
        hidden = []
        for _ in range(nh):
            hidden.append((refs[pos], refs[pos + 1]))
            pos += 2
        sel_ref, bt_ref, btb_ref = refs[pos:pos + 3]
        o_ref = refs[pos + 3]

        def mm(a, b):
            return jnp.dot(a, b, preferred_element_type=f32)

        # Per-image halo masks (zero the row that wrapped across an image
        # boundary after a roll).  Tiny VPU work, computed once.
        rows = lax.broadcasted_iota(jnp.int32, (R, 1), 0)
        m_top = (rows % H != 0).astype(f32)
        m_bot = (rows % H != (H - 1)).astype(f32)

        def prev_row(a):   # row r-1 of the same image, zero at image top
            return pltpu.roll(a, 1, 0) * m_top

        def next_row(a):   # row r+1 of the same image, zero at image bottom
            return pltpu.roll(a, R - 1, 0) * m_bot

        # ---- head: ConvTranspose2d(k=2,s=2) + ReLU, parity-split rows ------
        # One merged matmul for both output-row parities (shared LHS).
        y = mm(x_ref[...].astype(bf16), g_ref[...])          # (R, 2*2W*C0)
        wc0 = bd_ref.shape[1]                                # 2W*C0
        head0 = jnp.maximum(y[:, :wc0] + bd_ref[...], 0.0)   # even output rows
        head1 = jnp.maximum(y[:, wc0:] + bd_ref[...], 0.0)   # odd  output rows
        # Dropout2d(p) is identity in eval mode.
        # TODO(synk): training-mode stochastic Dropout2d not implemented.

        # ---- hidden: n x (Conv3x3 pad=1 + ReLU), one deep-K matmul each -----
        # Even output rows use taps (a1[h-1], a0[h], a1[h]);
        # odd  output rows use taps (a0[h],  a1[h], a0[h+1]).
        a0, a1 = head0, head1
        for (w_ref, b_ref) in hidden:
            cat_e = jnp.concatenate([prev_row(a1), a0, a1], axis=-1)
            cat_o = jnp.concatenate([a0, a1, next_row(a0)], axis=-1)
            big = jnp.concatenate([cat_e, cat_o], axis=0).astype(bf16)  # (2R,3K)
            res = jnp.maximum(mm(big, w_ref[...]) + b_ref[...], 0.0)
            a0, a1 = res[:R], res[R:]

        # ---- residual add + MaxPool2d(2,2) ----------------------------------
        s0 = head0 + a0
        s1 = head1 + a1
        rm = jnp.maximum(s0, s1)                 # row-pair max (VPU, no matmul)
        t = mm(rm.astype(bf16), sel_ref[...])    # even/odd column pick (exact)
        half = sel_ref.shape[1] // 2             # W*C
        pooled = jnp.maximum(t[:, :half], t[:, half:])       # (R, W*C)

        # ---- tail: Conv3x3 pad=1 + ReLU (one deep-K matmul) -----------------
        cat = jnp.concatenate([prev_row(pooled), pooled, next_row(pooled)],
                              axis=-1).astype(bf16)          # (R, 3*W*C)
        o_ref[...] = jnp.maximum(mm(cat, bt_ref[...]) + btb_ref[...], 0.0)

    return kernel


# ---------------------------------------------------------------------------
# One-time parameter preparation (kh-stacked banded weights, merged selectors).
# ---------------------------------------------------------------------------
def _conv_banded_stacked(w, Wr):
    # w: (Cout, Cin, 3, 3) PyTorch Conv2d layout -> (3*Wr*Cin, Wr*Cout) bf16,
    # kh-major stacking so a [tap0|tap1|tap2] lane-concat contracts correctly.
    Cout, Cin = w.shape[0], w.shape[1]
    f32 = jnp.float32
    mats = []
    for kh in range(3):
        B = jnp.zeros((Wr, Cin, Wr, Cout), f32)
        for kw in range(3):
            D = jnp.eye(Wr, k=1 - kw, dtype=f32)     # D[v,w]=1 iff v = w+kw-1
            B = B + jnp.einsum("vw,oc->vcwo", D, w[:, :, kh, kw].astype(f32))
        mats.append(B.reshape(Wr * Cin, Wr * Cout))
    return jnp.concatenate(mats, axis=0).astype(jnp.bfloat16)


def _deconv_mat(wd, W):
    # wd: (Cin, C0, 2, 2) -> (W*Cin, 2 * 2W*C0) bf16 (both row parities along N)
    Cin, C0 = wd.shape[0], wd.shape[1]
    f32 = jnp.float32
    eyeW = jnp.eye(W, dtype=f32)
    Gs = []
    for p in range(2):
        per_q = [jnp.einsum("jJ,cd->jcJd", eyeW, wd[:, :, p, q].astype(f32))
                 for q in range(2)]                  # (W, Cin, W, C0)
        Gs.append(jnp.stack(per_q, axis=3).reshape(W * Cin, 2 * W * C0))
    return jnp.concatenate(Gs, axis=-1).astype(jnp.bfloat16)


def _pool_sel(W, C):
    # Column max-pool selectors (even | odd), merged along N, exact in bf16.
    W2 = 2 * W
    f32 = jnp.float32
    eyeC = jnp.eye(C, dtype=f32)
    cols = jnp.arange(W2)[:, None]
    sels = []
    for par in range(2):
        M = (cols == 2 * jnp.arange(W)[None, :] + par).astype(f32)
        sels.append(jnp.einsum("wj,cC->wcjC", M, eyeC).reshape(W2 * C, W * C))
    return jnp.concatenate(sels, axis=-1).astype(jnp.bfloat16)


def prepare_encoder_params(params, H, W):
    del H  # structure matrices no longer depend on the row count
    f32 = jnp.float32
    wd = params["deconv_w"]                           # (Cin, C0, 2, 2)
    C0 = wd.shape[1]
    W2 = 2 * W

    G = _deconv_mat(wd, W)
    b_dec = jnp.tile(params["deconv_b"].astype(f32), (W2,))[None, :]

    hidden = []
    for (w, b) in params["hidden"]:
        hidden.append((_conv_banded_stacked(w, W2),
                       jnp.tile(b.astype(f32), (W2,))[None, :]))

    Clast = params["hidden"][-1][0].shape[0] if params["hidden"] else C0
    # residual add (head + hidden) requires matching channel counts, as in PyTorch
    assert Clast == C0, "hidden_channels[-1] must equal hidden_channels[0]"

    Sel = _pool_sel(W, Clast)
    B_tail = _conv_banded_stacked(params["tail_w"], W)
    b_tail = jnp.tile(params["tail_b"].astype(f32), (W,))[None, :]

    return dict(G=G, b_dec=b_dec, hidden=hidden, Sel=Sel,
                B_tail=B_tail, b_tail=b_tail)


# ---------------------------------------------------------------------------
# Forward: NCHW in -> one fused pallas_call -> NCHW out.
# ---------------------------------------------------------------------------
@jax.jit
def encoder_block_forward(x_nchw, prep):
    N, Cin, H, W = x_nchw.shape
    # Row-dense slab: (N*H, W*Cin).  The NCHW<->slab transposes stay in XLA;
    # at these sizes they are a few KiB each.
    x_flat = jnp.transpose(x_nchw, (0, 2, 3, 1)).reshape(N * H, W * Cin)
    x_flat = x_flat.astype(jnp.float32)

    hidden = prep["hidden"]
    nh = len(hidden)
    WCout = prep["b_tail"].shape[1]
    Cout = WCout // W

    # Fold the whole batch into the matmul M dimension (largest utilization
    # lever).  For large N, lower images_per_step (keep N % images_per_step
    # == 0) to re-enable pipelining and an even grid for v7x megacore.
    images_per_step = N
    R = images_per_step * H
    grid = (N // images_per_step,)

    def cspec(a):
        return pl.BlockSpec(a.shape, lambda i: (0, 0))

    in_arrays = [x_flat, prep["G"], prep["b_dec"]]
    in_specs = [pl.BlockSpec((R, W * Cin), lambda i: (i, 0)),
                cspec(prep["G"]), cspec(prep["b_dec"])]
    for (B_l, bias_l) in hidden:
        in_arrays += [B_l, bias_l]
        in_specs += [cspec(B_l), cspec(bias_l)]
    in_arrays += [prep["Sel"], prep["B_tail"], prep["b_tail"]]
    in_specs += [cspec(prep["Sel"]), cspec(prep["B_tail"]), cspec(prep["b_tail"])]

    out_flat = pl.pallas_call(
        _make_encoder_kernel(nh, H, R),
        out_shape=jax.ShapeDtypeStruct((N * H, WCout), jnp.float32),
        grid=grid,
        in_specs=in_specs,
        out_specs=pl.BlockSpec((R, WCout), lambda i: (i, 0)),
        compiler_params=pltpu.CompilerParams(
            dimension_semantics=("parallel",),
            vmem_limit_bytes=48 * 1024 * 1024),   # <= v7x 64 MiB physical
    )(*in_arrays)

    return out_flat.reshape(N, H, W, Cout).transpose(0, 3, 1, 2)


# ---------------------------------------------------------------------------
# Parameter init (PyTorch-style uniform fan-in) and pure-XLA reference.
# ---------------------------------------------------------------------------
def init_params(key, in_ch, hidden_chs, out_ch):
    def uni(k, shape, fan_in):
        bound = 1.0 / float(np.sqrt(fan_in))
        return jax.random.uniform(k, shape, jnp.float32, -bound, bound)

    keys = iter(jax.random.split(key, 4 + 2 * len(hidden_chs)))
    params = {}
    params["deconv_w"] = uni(next(keys), (in_ch, hidden_chs[0], 2, 2), in_ch * 4)
    params["deconv_b"] = uni(next(keys), (hidden_chs[0],), in_ch * 4)
    hidden = []
    last = hidden_chs[0]
    for hc in hidden_chs:
        w = uni(next(keys), (hc, last, 3, 3), last * 9)
        b = uni(next(keys), (hc,), last * 9)
        hidden.append((w, b))
        last = hc
    params["hidden"] = hidden
    params["tail_w"] = uni(next(keys), (out_ch, last, 3, 3), last * 9)
    params["tail_b"] = uni(next(keys), (out_ch,), last * 9)
    return params


def reference_forward(x_nchw, params):
    x = jnp.transpose(x_nchw, (0, 2, 3, 1)).astype(jnp.float32)
    N, H, W, _ = x.shape
    wd = params["deconv_w"]
    Cout0 = wd.shape[1]
    y = jnp.einsum("nhwc,copq->nhpwqo", x, wd)
    y = y.reshape(N, 2 * H, 2 * W, Cout0) + params["deconv_b"]
    head = jnp.maximum(y, 0.0)

    def conv(xx, w, b):
        wk = jnp.transpose(w, (2, 3, 1, 0))
        out = lax.conv_general_dilated(
            xx, wk, (1, 1), "SAME",
            dimension_numbers=("NHWC", "HWIO", "NHWC"))
        return jnp.maximum(out + b, 0.0)

    h = head
    for w, b in params["hidden"]:
        h = conv(h, w, b)
    s = head + h
    pooled = lax.reduce_window(s, -jnp.inf, lax.max,
                               (1, 2, 2, 1), (1, 2, 2, 1), "VALID")
    out = conv(pooled, params["tail_w"], params["tail_b"])
    return jnp.transpose(out, (0, 3, 1, 2))


if __name__ == "__main__":
    in_ch, hidden_chs, out_ch = 4, [8, 8], 4
    key = jax.random.PRNGKey(0)
    k_x, k_p = jax.random.split(key)
    x = jax.random.normal(k_x, (2, in_ch, 16, 16), jnp.float32)  # NCHW
    params = init_params(k_p, in_ch, hidden_chs, out_ch)
    prep = prepare_encoder_params(params, H=16, W=16)

    out = jax.block_until_ready(encoder_block_forward(x, prep))
    ref = jax.block_until_ready(reference_forward(x, params))

    assert out.shape == (2, out_ch, 16, 16), out.shape
    # bf16 MXU path for the weight matmuls -> ~1e-2 relative difference vs f32.
    np.testing.assert_allclose(np.asarray(out), np.asarray(ref),
                               rtol=2e-2, atol=2e-2)
    print("KERNEL_OK")
</pallas_src>

<mosaic_0001>
module attributes {stable_mosaic.version = 11 : i64} {
  func.func @kernel(%arg0: i32, %arg1: memref<32x64xf32, #tpu.memory_space<vmem>>, %arg2: memref<64x512xbf16, #tpu.memory_space<vmem>>, %arg3: memref<1x256xf32, #tpu.memory_space<vmem>>, %arg4: memref<768x256xbf16, #tpu.memory_space<vmem>>, %arg5: memref<1x256xf32, #tpu.memory_space<vmem>>, %arg6: memref<768x256xbf16, #tpu.memory_space<vmem>>, %arg7: memref<1x256xf32, #tpu.memory_space<vmem>>, %arg8: memref<256x256xbf16, #tpu.memory_space<vmem>>, %arg9: memref<384x64xbf16, #tpu.memory_space<vmem>>, %arg10: memref<1x64xf32, #tpu.memory_space<vmem>>, %arg11: memref<32x64xf32, #tpu.memory_space<vmem>>) attributes {dimension_semantics = [#tpu.dimension_semantics<parallel>], iteration_bounds = array<i64: 1>, scalar_prefetch = 0 : i64, scratch_operands = 0 : i64, tpu.core_type = #tpu.core_type<tc>, window_params = [{transform_indices = @transform_0, window_bounds = array<i64: 32, 64>}, {pipeline_mode = #tpu.pipeline_mode<synchronous>, transform_indices = @transform_1, window_bounds = array<i64: 64, 512>}, {pipeline_mode = #tpu.pipeline_mode<synchronous>, transform_indices = @transform_2, window_bounds = array<i64: 1, 256>}, {pipeline_mode = #tpu.pipeline_mode<synchronous>, transform_indices = @transform_3, window_bounds = array<i64: 768, 256>}, {pipeline_mode = #tpu.pipeline_mode<synchronous>, transform_indices = @transform_4, window_bounds = array<i64: 1, 256>}, {pipeline_mode = #tpu.pipeline_mode<synchronous>, transform_indices = @transform_5, window_bounds = array<i64: 768, 256>}, {pipeline_mode = #tpu.pipeline_mode<synchronous>, transform_indices = @transform_6, window_bounds = array<i64: 1, 256>}, {pipeline_mode = #tpu.pipeline_mode<synchronous>, transform_indices = @transform_7, window_bounds = array<i64: 256, 256>}, {pipeline_mode = #tpu.pipeline_mode<synchronous>, transform_indices = @transform_8, window_bounds = array<i64: 384, 64>}, {pipeline_mode = #tpu.pipeline_mode<synchronous>, transform_indices = @transform_9, window_bounds = array<i64: 1, 64>}, {transform_indices = @transform_10, window_bounds = array<i64: 32, 64>}]} {
    %0 = tpu.iota {dimensions = array<i32: 0>} : vector<32x1xi32>
    %c16_i32 = arith.constant 16 : i32
    %c0_i32 = arith.constant 0 : i32
    %1 = arith.cmpi eq, %c16_i32, %c0_i32 : i32
    %c1_i32 = arith.constant 1 : i32
    %2 = arith.select %1, %c1_i32, %c16_i32 : i32
    %3 = vector.broadcast %2 : i32 to vector<32x1xi32>
    %4 = arith.remsi %0, %3 : vector<32x1xi32>
    %c0_i32_0 = arith.constant 0 : i32
    %5 = vector.broadcast %c0_i32_0 : i32 to vector<32x1xi32>
    %6 = arith.cmpi ne, %4, %5 : vector<32x1xi32>
    %c0_i32_1 = arith.constant 0 : i32
    %7 = vector.broadcast %c0_i32_1 : i32 to vector<32x1xi32>
    %8 = arith.cmpi slt, %4, %7 : vector<32x1xi32>
    %c0_i32_2 = arith.constant 0 : i32
    %9 = arith.cmpi slt, %2, %c0_i32_2 : i32
    %10 = vector.broadcast %9 : i1 to vector<32x1xi1>
    %11 = vector.broadcast %10 : vector<32x1xi1> to vector<32x1xi1>
    %12 = arith.xori %8, %11 : vector<32x1xi1>
    %13 = arith.andi %12, %6 : vector<32x1xi1>
    %14 = vector.broadcast %2 : i32 to vector<32x1xi32>
    %15 = arith.addi %4, %14 : vector<32x1xi32>
    %16 = arith.select %13, %15, %4 : vector<32x1xi1>, vector<32x1xi32>
    %c0_i32_3 = arith.constant 0 : i32
    %17 = vector.broadcast %c0_i32_3 : i32 to vector<32x1xi32>
    %18 = arith.cmpi ne, %16, %17 : vector<32x1xi32>
    %19 = arith.extui %18 : vector<32x1xi1> to vector<32x1xi32>
    %20 = arith.sitofp %19 : vector<32x1xi32> to vector<32x1xf32>
    %c16_i32_4 = arith.constant 16 : i32
    %c0_i32_5 = arith.constant 0 : i32
    %21 = arith.cmpi eq, %c16_i32_4, %c0_i32_5 : i32
    %c1_i32_6 = arith.constant 1 : i32
    %22 = arith.select %21, %c1_i32_6, %c16_i32_4 : i32
    %23 = vector.broadcast %22 : i32 to vector<32x1xi32>
    %24 = arith.remsi %0, %23 : vector<32x1xi32>
    %c0_i32_7 = arith.constant 0 : i32
    %25 = vector.broadcast %c0_i32_7 : i32 to vector<32x1xi32>
    %26 = arith.cmpi ne, %24, %25 : vector<32x1xi32>
    %c0_i32_8 = arith.constant 0 : i32
    %27 = vector.broadcast %c0_i32_8 : i32 to vector<32x1xi32>
    %28 = arith.cmpi slt, %24, %27 : vector<32x1xi32>
    %c0_i32_9 = arith.constant 0 : i32
    %29 = arith.cmpi slt, %22, %c0_i32_9 : i32
    %30 = vector.broadcast %29 : i1 to vector<32x1xi1>
    %31 = vector.broadcast %30 : vector<32x1xi1> to vector<32x1xi1>
    %32 = arith.xori %28, %31 : vector<32x1xi1>
    %33 = arith.andi %32, %26 : vector<32x1xi1>
    %34 = vector.broadcast %22 : i32 to vector<32x1xi32>
    %35 = arith.addi %24, %34 : vector<32x1xi32>
    %36 = arith.select %33, %35, %24 : vector<32x1xi1>, vector<32x1xi32>
    %c15_i32 = arith.constant 15 : i32
    %37 = vector.broadcast %c15_i32 : i32 to vector<32x1xi32>
    %38 = arith.cmpi ne, %36, %37 : vector<32x1xi32>
    %39 = arith.extui %38 : vector<32x1xi1> to vector<32x1xi32>
    %40 = arith.sitofp %39 : vector<32x1xi32> to vector<32x1xf32>
    %c0 = arith.constant 0 : index
    %c0_10 = arith.constant 0 : index
    %41 = vector.load %arg1[%c0, %c0_10] : memref<32x64xf32, #tpu.memory_space<vmem>>, vector<32x64xf32>
    %42 = arith.truncf %41 : vector<32x64xf32> to vector<32x64xbf16>
    %c0_11 = arith.constant 0 : index
    %c0_12 = arith.constant 0 : index
    %43 = vector.load %arg2[%c0_11, %c0_12] : memref<64x512xbf16, #tpu.memory_space<vmem>>, vector<64x512xbf16>
    %cst = arith.constant dense<0.000000e+00> : vector<32x512xf32>
    %44 = tpu.matmul %42, %43, %cst {dimension_numbers = #tpu.dot_dimension_numbers<[1], [0], [0], [1], [0, 0, 1, 1], [], []>} : vector<32x64xbf16>, vector<64x512xbf16>, vector<32x512xf32> -> vector<32x512xf32>
    %45 = vector.extract_strided_slice %44 {offsets = [0, 0], sizes = [32, 256], strides = [1, 1]} : vector<32x512xf32> to vector<32x256xf32>
    %c0_13 = arith.constant 0 : index
    %c0_14 = arith.constant 0 : index
    %46 = vector.load %arg3[%c0_13, %c0_14] : memref<1x256xf32, #tpu.memory_space<vmem>>, vector<1x256xf32>
    %47 = vector.broadcast %46 : vector<1x256xf32> to vector<32x256xf32>
    %48 = arith.addf %45, %47 : vector<32x256xf32>
    %cst_15 = arith.constant 0.000000e+00 : f32
    %49 = vector.broadcast %cst_15 : f32 to vector<32x256xf32>
    %50 = arith.maximumf %48, %49 : vector<32x256xf32>
    %51 = vector.extract_strided_slice %44 {offsets = [0, 256], sizes = [32, 256], strides = [1, 1]} : vector<32x512xf32> to vector<32x256xf32>
    %c0_16 = arith.constant 0 : index
    %c0_17 = arith.constant 0 : index
    %52 = vector.load %arg3[%c0_16, %c0_17] : memref<1x256xf32, #tpu.memory_space<vmem>>, vector<1x256xf32>
    %53 = vector.broadcast %52 : vector<1x256xf32> to vector<32x256xf32>
    %54 = arith.addf %51, %53 : vector<32x256xf32>
    %cst_18 = arith.constant 0.000000e+00 : f32
    %55 = vector.broadcast %cst_18 : f32 to vector<32x256xf32>
    %56 = arith.maximumf %54, %55 : vector<32x256xf32>
    %c1_i32_19 = arith.constant 1 : i32
    %57 = tpu.dynamic_rotate %56 by %c1_i32_19 dim 0 : vector<32x256xf32>, i32 -> vector<32x256xf32>
    %58 = vector.broadcast %20 : vector<32x1xf32> to vector<32x256xf32>
    %59 = arith.mulf %57, %58 : vector<32x256xf32>
    %60 = tpu.concatenate %59, %50, %56 in 1 : vector<32x256xf32>, vector<32x256xf32>, vector<32x256xf32> -> vector<32x768xf32>
    %c31_i32 = arith.constant 31 : i32
    %61 = tpu.dynamic_rotate %50 by %c31_i32 dim 0 : vector<32x256xf32>, i32 -> vector<32x256xf32>
    %62 = vector.broadcast %40 : vector<32x1xf32> to vector<32x256xf32>
    %63 = arith.mulf %61, %62 : vector<32x256xf32>
    %64 = tpu.concatenate %50, %56, %63 in 1 : vector<32x256xf32>, vector<32x256xf32>, vector<32x256xf32> -> vector<32x768xf32>
    %65 = tpu.concatenate %60, %64 in 0 : vector<32x768xf32>, vector<32x768xf32> -> vector<64x768xf32>
    %66 = arith.truncf %65 : vector<64x768xf32> to vector<64x768xbf16>
    %c0_20 = arith.constant 0 : index
    %c0_21 = arith.constant 0 : index
    %67 = vector.load %arg4[%c0_20, %c0_21] : memref<768x256xbf16, #tpu.memory_space<vmem>>, vector<768x256xbf16>
    %cst_22 = arith.constant dense<0.000000e+00> : vector<64x256xf32>
    %68 = tpu.matmul %66, %67, %cst_22 {dimension_numbers = #tpu.dot_dimension_numbers<[1], [0], [0], [1], [0, 0, 1, 1], [], []>} : vector<64x768xbf16>, vector<768x256xbf16>, vector<64x256xf32> -> vector<64x256xf32>
    %c0_23 = arith.constant 0 : index
    %c0_24 = arith.constant 0 : index
    %69 = vector.load %arg5[%c0_23, %c0_24] : memref<1x256xf32, #tpu.memory_space<vmem>>, vector<1x256xf32>
    %70 = vector.broadcast %69 : vector<1x256xf32> to vector<64x256xf32>
    %71 = arith.addf %68, %70 : vector<64x256xf32>
    %cst_25 = arith.constant 0.000000e+00 : f32
    %72 = vector.broadcast %cst_25 : f32 to vector<64x256xf32>
    %73 = arith.maximumf %71, %72 : vector<64x256xf32>
    %74 = vector.extract_strided_slice %73 {offsets = [0, 0], sizes = [32, 256], strides = [1, 1]} : vector<64x256xf32> to vector<32x256xf32>
    %75 = vector.extract_strided_slice %73 {offsets = [32, 0], sizes = [32, 256], strides = [1, 1]} : vector<64x256xf32> to vector<32x256xf32>
    %c1_i32_26 = arith.constant 1 : i32
    %76 = tpu.dynamic_rotate %75 by %c1_i32_26 dim 0 : vector<32x256xf32>, i32 -> vector<32x256xf32>
    %77 = vector.broadcast %20 : vector<32x1xf32> to vector<32x256xf32>
    %78 = arith.mulf %76, %77 : vector<32x256xf32>
    %79 = tpu.concatenate %78, %74, %75 in 1 : vector<32x256xf32>, vector<32x256xf32>, vector<32x256xf32> -> vector<32x768xf32>
    %c31_i32_27 = arith.constant 31 : i32
    %80 = tpu.dynamic_rotate %74 by %c31_i32_27 dim 0 : vector<32x256xf32>, i32 -> vector<32x256xf32>
    %81 = vector.broadcast %40 : vector<32x1xf32> to vector<32x256xf32>
    %82 = arith.mulf %80, %81 : vector<32x256xf32>
    %83 = tpu.concatenate %74, %75, %82 in 1 : vector<32x256xf32>, vector<32x256xf32>, vector<32x256xf32> -> vector<32x768xf32>
    %84 = tpu.concatenate %79, %83 in 0 : vector<32x768xf32>, vector<32x768xf32> -> vector<64x768xf32>
    %85 = arith.truncf %84 : vector<64x768xf32> to vector<64x768xbf16>
    %c0_28 = arith.constant 0 : index
    %c0_29 = arith.constant 0 : index
    %86 = vector.load %arg6[%c0_28, %c0_29] : memref<768x256xbf16, #tpu.memory_space<vmem>>, vector<768x256xbf16>
    %cst_30 = arith.constant dense<0.000000e+00> : vector<64x256xf32>
    %87 = tpu.matmul %85, %86, %cst_30 {dimension_numbers = #tpu.dot_dimension_numbers<[1], [0], [0], [1], [0, 0, 1, 1], [], []>} : vector<64x768xbf16>, vector<768x256xbf16>, vector<64x256xf32> -> vector<64x256xf32>
    %c0_31 = arith.constant 0 : index
    %c0_32 = arith.constant 0 : index
    %88 = vector.load %arg7[%c0_31, %c0_32] : memref<1x256xf32, #tpu.memory_space<vmem>>, vector<1x256xf32>
    %89 = vector.broadcast %88 : vector<1x256xf32> to vector<64x256xf32>
    %90 = arith.addf %87, %89 : vector<64x256xf32>
    %cst_33 = arith.constant 0.000000e+00 : f32
    %91 = vector.broadcast %cst_33 : f32 to vector<64x256xf32>
    %92 = arith.maximumf %90, %91 : vector<64x256xf32>
    %93 = vector.extract_strided_slice %92 {offsets = [0, 0], sizes = [32, 256], strides = [1, 1]} : vector<64x256xf32> to vector<32x256xf32>
    %94 = vector.extract_strided_slice %92 {offsets = [32, 0], sizes = [32, 256], strides = [1, 1]} : vector<64x256xf32> to vector<32x256xf32>
    %95 = arith.addf %50, %93 : vector<32x256xf32>
    %96 = arith.addf %56, %94 : vector<32x256xf32>
    %97 = arith.maximumf %95, %96 : vector<32x256xf32>
    %98 = arith.truncf %97 : vector<32x256xf32> to vector<32x256xbf16>
    %c0_34 = arith.constant 0 : index
    %c0_35 = arith.constant 0 : index
    %99 = vector.load %arg8[%c0_34, %c0_35] : memref<256x256xbf16, #tpu.memory_space<vmem>>, vector<256x256xbf16>
    %cst_36 = arith.constant dense<0.000000e+00> : vector<32x256xf32>
    %100 = tpu.matmul %98, %99, %cst_36 {dimension_numbers = #tpu.dot_dimension_numbers<[1], [0], [0], [1], [0, 0, 1, 1], [], []>} : vector<32x256xbf16>, vector<256x256xbf16>, vector<32x256xf32> -> vector<32x256xf32>
    %101 = vector.extract_strided_slice %100 {offsets = [0, 0], sizes = [32, 128], strides = [1, 1]} : vector<32x256xf32> to vector<32x128xf32>
    %102 = vector.extract_strided_slice %100 {offsets = [0, 128], sizes = [32, 128], strides = [1, 1]} : vector<32x256xf32> to vector<32x128xf32>
    %103 = arith.maximumf %101, %102 : vector<32x128xf32>
    %c1_i32_37 = arith.constant 1 : i32
    %104 = tpu.dynamic_rotate %103 by %c1_i32_37 dim 0 : vector<32x128xf32>, i32 -> vector<32x128xf32>
    %105 = vector.broadcast %20 : vector<32x1xf32> to vector<32x128xf32>
    %106 = arith.mulf %104, %105 : vector<32x128xf32>
    %c31_i32_38 = arith.constant 31 : i32
    %107 = tpu.dynamic_rotate %103 by %c31_i32_38 dim 0 : vector<32x128xf32>, i32 -> vector<32x128xf32>
    %108 = vector.broadcast %40 : vector<32x1xf32> to vector<32x128xf32>
    %109 = arith.mulf %107, %108 : vector<32x128xf32>
    %110 = tpu.concatenate %106, %103, %109 in 1 : vector<32x128xf32>, vector<32x128xf32>, vector<32x128xf32> -> vector<32x384xf32>
    %111 = arith.truncf %110 : vector<32x384xf32> to vector<32x384xbf16>
    %c0_39 = arith.constant 0 : index
    %c0_40 = arith.constant 0 : index
    %112 = vector.load %arg9[%c0_39, %c0_40] : memref<384x64xbf16, #tpu.memory_space<vmem>>, vector<384x64xbf16>
    %cst_41 = arith.constant dense<0.000000e+00> : vector<32x64xf32>
    %113 = tpu.matmul %111, %112, %cst_41 {dimension_numbers = #tpu.dot_dimension_numbers<[1], [0], [0], [1], [0, 0, 1, 1], [], []>} : vector<32x384xbf16>, vector<384x64xbf16>, vector<32x64xf32> -> vector<32x64xf32>
    %c0_42 = arith.constant 0 : index
    %c0_43 = arith.constant 0 : index
    %114 = vector.load %arg10[%c0_42, %c0_43] : memref<1x64xf32, #tpu.memory_space<vmem>>, vector<1x64xf32>
    %115 = vector.broadcast %114 : vector<1x64xf32> to vector<32x64xf32>
    %116 = arith.addf %113, %115 : vector<32x64xf32>
    %cst_44 = arith.constant 0.000000e+00 : f32
    %117 = vector.broadcast %cst_44 : f32 to vector<32x64xf32>
    %118 = arith.maximumf %116, %117 : vector<32x64xf32>
    %c0_45 = arith.constant 0 : index
    %c0_46 = arith.constant 0 : index
    %119 = vector.load %arg11[%c0_45, %c0_46] : memref<32x64xf32, #tpu.memory_space<vmem>>, vector<32x64xf32>
    tpu.vector_store %arg11[%c0_45, %c0_46], %118 {strides = array<i32>} : memref<32x64xf32, #tpu.memory_space<vmem>>, vector<32x64xf32>,
    return
  }
  func.func @transform_0(%arg0: i32) -> (i32, i32) {
    %c0_i32 = arith.constant 0 : i32
    %c0_i32_0 = arith.constant 0 : i32
    return %arg0, %c0_i32 : i32, i32
  }
  func.func @transform_1(%arg0: i32) -> (i32, i32) {
    %c0_i32 = arith.constant 0 : i32
    %c0_i32_0 = arith.constant 0 : i32
    %c0_i32_1 = arith.constant 0 : i32
    return %c0_i32, %c0_i32_0 : i32, i32
  }
  func.func @transform_2(%arg0: i32) -> (i32, i32) {
    %c0_i32 = arith.constant 0 : i32
    %c0_i32_0 = arith.constant 0 : i32
    %c0_i32_1 = arith.constant 0 : i32
    return %c0_i32, %c0_i32_0 : i32, i32
  }
  func.func @transform_3(%arg0: i32) -> (i32, i32) {
    %c0_i32 = arith.constant 0 : i32
    %c0_i32_0 = arith.constant 0 : i32
    %c0_i32_1 = arith.constant 0 : i32
    return %c0_i32, %c0_i32_0 : i32, i32
  }
  func.func @transform_4(%arg0: i32) -> (i32, i32) {
    %c0_i32 = arith.constant 0 : i32
    %c0_i32_0 = arith.constant 0 : i32
    %c0_i32_1 = arith.constant 0 : i32
    return %c0_i32, %c0_i32_0 : i32, i32
  }
  func.func @transform_5(%arg0: i32) -> (i32, i32) {
    %c0_i32 = arith.constant 0 : i32
    %c0_i32_0 = arith.constant 0 : i32
    %c0_i32_1 = arith.constant 0 : i32
    return %c0_i32, %c0_i32_0 : i32, i32
  }
  func.func @transform_6(%arg0: i32) -> (i32, i32) {
    %c0_i32 = arith.constant 0 : i32
    %c0_i32_0 = arith.constant 0 : i32
    %c0_i32_1 = arith.constant 0 : i32
    return %c0_i32, %c0_i32_0 : i32, i32
  }
  func.func @transform_7(%arg0: i32) -> (i32, i32) {
    %c0_i32 = arith.constant 0 : i32
    %c0_i32_0 = arith.constant 0 : i32
    %c0_i32_1 = arith.constant 0 : i32
    return %c0_i32, %c0_i32_0 : i32, i32
  }
  func.func @transform_8(%arg0: i32) -> (i32, i32) {
    %c0_i32 = arith.constant 0 : i32
    %c0_i32_0 = arith.constant 0 : i32
    %c0_i32_1 = arith.constant 0 : i32
    return %c0_i32, %c0_i32_0 : i32, i32
  }
  func.func @transform_9(%arg0: i32) -> (i32, i32) {
    %c0_i32 = arith.constant 0 : i32
    %c0_i32_0 = arith.constant 0 : i32
    %c0_i32_1 = arith.constant 0 : i32
    return %c0_i32, %c0_i32_0 : i32, i32
  }
  func.func @transform_10(%arg0: i32) -> (i32, i32) {
    %c0_i32 = arith.constant 0 : i32
    %c0_i32_0 = arith.constant 0 : i32
    return %arg0, %c0_i32 : i32, i32
  }
}

</mosaic_0001>

<bundles_post_ra>
// kernel: encoder_block_forward.1
= control target key start
LH: loop header
LB: loop body
LE: loop exit
PB: predicated region body
PF: predicated region fallthrough
CT: control target
= control target key end

     0   :  { %15 = vsyncpa [#allocation3], 0  ;;  %s4435_s0 = inlined_call_operand.vmem [shape: f32[32,64], index: 0, kind: input, shape index: {}]   ;;  %s4436_s1 = inlined_call_operand.hbm [shape: bf16[64,512], index: 1, kind: input, shape index: {}]   ;;  %s4437_s2 = inlined_call_operand.vmem [shape: f32[1,256], index: 2, kind: input, shape index: {}]   ;;  %s4438_s3 = inlined_call_operand.vmem [shape: bf16[768,256], index: 3, kind: input, shape index: {}]   ;;  %s4439_s4 = inlined_call_operand.vmem [shape: f32[1,256], index: 4, kind: input, shape index: {}]   ;;  %s4440_s5 = inlined_call_operand.hbm [shape: bf16[768,256], index: 5, kind: input, shape index: {}]   ;;  %s4441_s6 = inlined_call_operand.vmem [shape: f32[1,256], index: 6, kind: input, shape index: {}]   ;;  %s4442_s7 = inlined_call_operand.hbm [shape: bf16[256,256], index: 7, kind: input, shape index: {}]   ;;  %s4443_s8 = inlined_call_operand.vmem [shape: bf16[384,64], index: 8, kind: input, shape index: {}]   ;;  %s4444_s9 = inlined_call_operand.vmem [shape: f32[1,64], index: 9, kind: input, shape index: {}]   ;;  %s4445_s10 = inlined_call_operand.vmem [shape: f32[32,64], index: 10, kind: output, shape index: {}]  }
   0x1   :  { %16 = vsyncpa [#allocation5], 0  ;;  %s3595_s13 = smov [#allocation4]  }
   0x2   :  { %s42_s14 = sshll.u32 %s3595_s13, 4  ;;  %s43_s14 = int_to_ptr.vmem [resolvable:$true] %s42_s14 }
   0x3   :  { %s3539_s15 = scalar_lea.vmem %s43_s14, 12288  ;;  %p3544_p1 = scmp.lt.s32.totalorder %s43_s14, %s43_s14 }
   0x4   :  { %p3540_p0 = scmp.ne.s32.totalorder %s43_s14, %s3539_s15  ;;  %p3545_p2 = scmp.lt.s32.totalorder %s3539_s15, %s3539_s15 }
   0x6   :  { %p3546_p3 = por %p3545_p2, %p3544_p1 }
   0x8   :  { %p3547_p4 = pnand %p3546_p3, %p3540_p0 }
   0xa   :  { %3550 = shalt.err (!%p3547_p4)
}
   0xb   :  { %s3596_s16 = smov 128   ;;  %s3597_s17 = smov 8  }
   0xc   :  { %48 = dma.hbm_to_vmem [thread:$0]  %s4440_s5, 12288, %s43_s14, [#allocation5], %s3596_s16, %s3596_s16, %s3597_s17  }
   0xd   :  { %s3598_s20 = smov [#allocation2]  }
   0xe   :  { %s24_s21 = sshll.u32 %s3598_s20, 4  ;;  %s25_s21 = int_to_ptr.vmem [resolvable:$true] %s24_s21 }
   0xf   :  { %s3559_s22 = scalar_lea.vmem %s25_s21, 2048  ;;  %p3564_p6 = scmp.lt.s32.totalorder %s25_s21, %s25_s21 }
  0x10   :  { %p3560_p5 = scmp.ne.s32.totalorder %s25_s21, %s3559_s22  ;;  %p3565_p7 = scmp.lt.s32.totalorder %s3559_s22, %s3559_s22 }
  0x12   :  { %p3566_p8 = por %p3565_p7, %p3564_p6 }
  0x14   :  { %p3567_p9 = pnand %p3566_p8, %p3560_p5 }
  0x16   :  { %3570 = shalt.err (!%p3567_p9)
}
  0x17   :  { %s3599_s23 = smov 256   ;;  %s3600_s24 = smov 16  }
  0x18   :  { %30 = dma.hbm_to_vmem [thread:$0]  %s4436_s1, 2048, %s25_s21, [#allocation3], %s3599_s23, %s3599_s23, %s3600_s24  }
  0x19   :  { %s3601_s27 = smov [#allocation6]  }
  0x1a   :  { %s56_s28 = sshll.u32 %s3601_s27, 4  ;;  %s57_s28 = int_to_ptr.vmem [resolvable:$true] %s56_s28 }
  0x1b   :  { %s3579_s5 = scalar_lea.vmem %s57_s28, 4096  ;;  %p3584_p11 = scmp.lt.s32.totalorder %s57_s28, %s57_s28 }
  0x1c   :  { %p3580_p10 = scmp.ne.s32.totalorder %s57_s28, %s3579_s5  ;;  %p3585_p12 = scmp.lt.s32.totalorder %s3579_s5, %s3579_s5 }
  0x1e   :  { %p3586_p13 = por %p3585_p12, %p3584_p11 }
  0x20   :  { %p3587_p0 = pnand %p3586_p13, %p3580_p10 }
  0x22   :  { %3590 = shalt.err (!%p3587_p0)
}
  0x23   :  { %62 = dma.hbm_to_vmem [thread:$0]  %s4442_s7, 4096, %s57_s28, [#allocation5], %s3596_s16, %s3596_s16, %s3597_s17  }
  0x24   :  { %3591 = dma.done.wait [#allocation3], 2048  }
  0x25   :  { %3592 = vsyncadd [#allocation3], 4294965248 }
  0x26   :  { %3593 = dma.done.wait [#allocation5], 16384  }
  0x27   :  { %3594 = vsyncadd [#allocation5], 4294950912  ;;  %v3602_v0 = vmov 0   ;;  %v3147_v1 = vld [vmem:[#allocation2 + $0x64] ss:$16 sps:$4 sm:$0xff]   ;;  %v155_v18 = vld [vmem:[%s4435_s0 + $0x8] sm:$0xff] }
  0x28   :  { %295 = vmatprep.mubr.bf16.mxu0 %v3602_v0  ;;  %348 = vmatprep.mubr.bf16.mxu1 %v3602_v0  ;;  %v3149_v2 = vld [vmem:[#allocation2 + $0x6c] ss:$16 sps:$4 sm:$0xff]   ;;  %v3151_v3 = vld [vmem:[#allocation2 + $0x60] ss:$16 sps:$4 sm:$0xff]   ;;  %v3152_v4 = vld [vmem:[#allocation2 + $0x68] ss:$16 sps:$4 sm:$0xff]  }
  0x29   :  { %271 = vmatprep.subr.bf16.mxu0 %v3147_v1  ;;  %324 = vmatprep.subr.bf16.mxu1 %v3149_v2  ;;  %v3153_v5 = vld [vmem:[#allocation2 + $0x44] ss:$16 sps:$4 sm:$0xff]   ;;  %v3155_v6 = vld [vmem:[#allocation2 + $0x4c] ss:$16 sps:$4 sm:$0xff]   ;;  %v3157_v7 = vld [vmem:[#allocation2 + $0x40] ss:$16 sps:$4 sm:$0xff]  }
  0x2a   :  { %272 = vmatpush1.bf16.msra.mxu0 %v3151_v3  ;;  %325 = vmatpush1.bf16.msra.mxu1 %v3152_v4  ;;  %v3158_v8 = vld [vmem:[#allocation2 + $0x48] ss:$16 sps:$4 sm:$0xff]   ;;  %v3159_v9 = vld [vmem:[#allocation2 + $0x24] ss:$16 sps:$4 sm:$0xff]   ;;  %v3161_v10 = vld [vmem:[#allocation2 + $0x2c] ss:$16 sps:$4 sm:$0xff]  }
  0x2b   :  { %273 = vmatprep.subr.bf16.mxu0 %v3153_v5  ;;  %326 = vmatprep.subr.bf16.mxu1 %v3155_v6  ;;  %v3163_v11 = vld [vmem:[#allocation2 + $0x20] ss:$16 sps:$4 sm:$0xff]   ;;  %v3164_v12 = vld [vmem:[#allocation2 + $0x28] ss:$16 sps:$4 sm:$0xff]   ;;  %v3165_v13 = vld [vmem:[#allocation2 + $0x4] ss:$16 sps:$4 sm:$0xff]  }
  0x2c   :  { %v3167_v14 = vld [vmem:[#allocation2 + $0xc] ss:$16 sps:$4 sm:$0xff]   ;;  %v3169_v15 = vld [vmem:[#allocation2] ss:$16 sps:$4 sm:$0xff]   ;;  %v3170_v16 = vld [vmem:[#allocation2 + $0x8] ss:$16 sps:$4 sm:$0xff]  }
  0x2d   :  { %v154_v17 = vld [vmem:[%s4435_s0] sm:$0xff]  ;;  %v3173_v19 = vld [vmem:[%s4438_s3 + $0x174] ss:$8 sps:$4 sm:$0xff]   ;;  %vm256_vm0 = vcmask 523264   ;;  %v3171_v21 = vld [vmem:[%s4438_s3 + $0x170] ss:$8 sps:$4 sm:$0xff]  }
  0x2e   :  { %274 = vmatpush1.bf16.msra.mxu0 %v3157_v7  ;;  %327 = vmatpush1.bf16.msra.mxu1 %v3158_v8  ;;  %v158_v20 = vpack.c.bf16 %v155_v18, %v154_v17  ;;  %v3182_v22 = vld [vmem:[%s4438_s3 + $0x74] ss:$8 sps:$4 sm:$0xff]   ;;  %v3176_v23 = vld [vmem:[%s4438_s3 + $0x164] ss:$8 sps:$4 sm:$0xff]   ;;  %v3180_v24 = vld [vmem:[%s4438_s3 + $0x70] ss:$8 sps:$4 sm:$0xff]  }
  0x2f   :  { %275 = vmatprep.subr.bf16.mxu0 %v3159_v9  ;;  %328 = vmatprep.subr.bf16.mxu1 %v3161_v10  ;;  %v156_v25 = vld [vmem:[%s4435_s0 + $0x10] sm:$0xff]  ;;  %v3188_v26 = vld [vmem:[%s4438_s3 + $0x64] ss:$8 sps:$4 sm:$0xff]   ;;  %v157_v27 = vld [vmem:[%s4435_s0 + $0x18] sm:$0xff] }
  0x30   :  { %v3174_v28 = vld [vmem:[%s4438_s3 + $0x160] ss:$8 sps:$4 sm:$0xff]   ;;  %v3179_v29 = vld [vmem:[%s4438_s3 + $0x154] ss:$8 sps:$4 sm:$0xff]   ;;  %v159_v31 = vpack.c.bf16 %v157_v27, %v156_v25  ;;  %v3177_v33 = vld [vmem:[%s4438_s3 + $0x150] ss:$8 sps:$4 sm:$0xff]  }
  0x31   :  { %v3186_v30 = vld [vmem:[%s4438_s3 + $0x60] ss:$8 sps:$4 sm:$0xff]   ;;  %v3194_v32 = vld [vmem:[%s4438_s3 + $0x54] ss:$8 sps:$4 sm:$0xff]   ;;  %v3185_v34 = vld [vmem:[%s4438_s3 + $0x144] ss:$8 sps:$4 sm:$0xff]  }
  0x32   :  { %276 = vmatpush1.bf16.msra.mxu0 %v3163_v11  ;;  %329 = vmatpush1.bf16.msra.mxu1 %v3164_v12  ;;  %v3192_v35 = vld [vmem:[%s4438_s3 + $0x50] ss:$8 sps:$4 sm:$0xff]   ;;  %v3200_v36 = vld [vmem:[%s4438_s3 + $0x44] ss:$8 sps:$4 sm:$0xff]   ;;  %v3183_v37 = vld [vmem:[%s4438_s3 + $0x140] ss:$8 sps:$4 sm:$0xff]  }
  0x33   :  { %277 = vmatprep.subr.bf16.mxu0 %v3165_v13  ;;  %330 = vmatprep.subr.bf16.mxu1 %v3167_v14  ;;  %v3191_v38 = vld [vmem:[%s4438_s3 + $0x134] ss:$8 sps:$4 sm:$0xff]   ;;  %v3198_v39 = vld [vmem:[%s4438_s3 + $0x40] ss:$8 sps:$4 sm:$0xff]   ;;  %v3189_v41 = vld [vmem:[%s4438_s3 + $0x130] ss:$8 sps:$4 sm:$0xff]  }
  0x34   :  { %v3206_v40 = vld [vmem:[%s4438_s3 + $0x34] ss:$8 sps:$4 sm:$0xff]   ;;  %v3197_v42 = vld [vmem:[%s4438_s3 + $0x124] ss:$8 sps:$4 sm:$0xff]   ;;  %v3204_v43 = vld [vmem:[%s4438_s3 + $0x30] ss:$8 sps:$4 sm:$0xff]  }
  0x35   :  { %v3212_v44 = vld [vmem:[%s4438_s3 + $0x24] ss:$8 sps:$4 sm:$0xff]   ;;  %v3195_v45 = vld [vmem:[%s4438_s3 + $0x120] ss:$8 sps:$4 sm:$0xff]   ;;  %v3203_v46 = vld [vmem:[%s4438_s3 + $0x114] ss:$8 sps:$4 sm:$0xff]  }
  0x36   :  { %278 = vmatpush1.bf16.msra.mxu0 %v3169_v15  ;;  %331 = vmatpush1.bf16.msra.mxu1 %v3170_v16  ;;  %v3210_v47 = vld [vmem:[%s4438_s3 + $0x20] ss:$8 sps:$4 sm:$0xff]   ;;  %v3218_v48 = vld [vmem:[%s4438_s3 + $0x14] ss:$8 sps:$4 sm:$0xff]   ;;  %v3201_v49 = vld [vmem:[%s4438_s3 + $0x110] ss:$8 sps:$4 sm:$0xff]  }
  0x37   :  { %1140 = vmatprep.subr.bf16.mxu1 %v3173_v19  ;;  %1067 = vmatprep.subr.bf16.mxu0 %v3182_v22  ;;  %v3209_v50 = vld [vmem:[%s4438_s3 + $0x104] ss:$8 sps:$4 sm:$0xff]   ;;  %v3216_v51 = vld [vmem:[%s4438_s3 + $0x10] ss:$8 sps:$4 sm:$0xff]   ;;  %v3207_v53 = vld [vmem:[%s4438_s3 + $0x100] ss:$8 sps:$4 sm:$0xff]  }
  0x38   :  { %v3224_v52 = vld [vmem:[%s4438_s3 + $0x4] ss:$8 sps:$4 sm:$0xff]   ;;  %v3215_v54 = vld [vmem:[%s4438_s3 + $0x1f4] ss:$8 sps:$4 sm:$0xff]   ;;  %v3222_v55 = vld [vmem:[%s4438_s3] ss:$8 sps:$4 sm:$0xff]  }
  0x39   :  { %2827 = vmatmul.mubr.msk.bf16.vlgmr.msra.gmra.mxu0 %vm256_vm0, %v158_v20  ;;  %2829 = vmatmul.mubr.msk.bf16.vlgmr.msra.gmra.mxu1 %vm256_vm0, %v158_v20  ;;  %v3230_v56 = vld [vmem:[%s4438_s3 + $0xf4] ss:$8 sps:$4 sm:$0xff]   ;;  %v3213_v57 = vld [vmem:[%s4438_s3 + $0x1f0] ss:$8 sps:$4 sm:$0xff]   ;;  %v3221_v58 = vld [vmem:[%s4438_s3 + $0x1e4] ss:$8 sps:$4 sm:$0xff]  }
  0x3a   :  { %305 = vmatprep.mubr.bf16.mxu0 %v3602_v0  ;;  %358 = vmatprep.mubr.bf16.mxu1 %v3602_v0  ;;  %v3228_v59 = vld [vmem:[%s4438_s3 + $0xf0] ss:$8 sps:$4 sm:$0xff]   ;;  %v3236_v60 = vld [vmem:[%s4438_s3 + $0xe4] ss:$8 sps:$4 sm:$0xff]   ;;  %v3219_v61 = vld [vmem:[%s4438_s3 + $0x1e0] ss:$8 sps:$4 sm:$0xff]  }
  0x3b   :  { %1141 = vmatpush1.bf16.msra.mxu1 %v3171_v21  ;;  %1068 = vmatpush1.bf16.msra.mxu0 %v3180_v24  ;;  %v3227_v62 = vld [vmem:[%s4438_s3 + $0x1d4] ss:$8 sps:$4 sm:$0xff]   ;;  %v3234_v63 = vld [vmem:[%s4438_s3 + $0xe0] ss:$8 sps:$4 sm:$0xff]   ;;  %v3225_v0 = vld [vmem:[%s4438_s3 + $0x1d0] ss:$8 sps:$4 sm:$0xff]   ;;  %v77_v24 = vlaneseq }
  0x3c   :  { %1142 = vmatprep.subr.bf16.mxu1 %v3176_v23  ;;  %1069 = vmatprep.subr.bf16.mxu0 %v3188_v26  ;;  %v3233_v1 = vld [vmem:[%s4438_s3 + $0x1c4] ss:$8 sps:$4 sm:$0xff]   ;;  %v3231_v2 = vld [vmem:[%s4438_s3 + $0x1c0] ss:$8 sps:$4 sm:$0xff]   ;;  %v3239_v3 = vld [vmem:[%s4438_s3 + $0x1b4] ss:$8 sps:$4 sm:$0xff]  }
  0x3d   :  { %v3237_v4 = vld [vmem:[%s4438_s3 + $0x1b0] ss:$8 sps:$4 sm:$0xff]   ;;  %v3242_v5 = vld [vmem:[%s4438_s3 + $0xd4] ss:$8 sps:$4 sm:$0xff]   ;;  %v3245_v6 = vld [vmem:[%s4438_s3 + $0x1a4] ss:$8 sps:$4 sm:$0xff]  }
  0x3e   :  { %v3240_v7 = vld [vmem:[%s4438_s3 + $0xd0] ss:$8 sps:$4 sm:$0xff]   ;;  %v3243_v8 = vld [vmem:[%s4438_s3 + $0x1a0] ss:$8 sps:$4 sm:$0xff]   ;;  %v3248_v9 = vld [vmem:[%s4438_s3 + $0xc4] ss:$8 sps:$4 sm:$0xff]  }
  0x3f   :  { %1143 = vmatpush1.bf16.msra.mxu1 %v3174_v28  ;;  %1070 = vmatpush1.bf16.msra.mxu0 %v3186_v30  ;;  %v3251_v10 = vld [vmem:[%s4438_s3 + $0x194] ss:$8 sps:$4 sm:$0xff]   ;;  %v3246_v11 = vld [vmem:[%s4438_s3 + $0xc0] ss:$8 sps:$4 sm:$0xff]   ;;  %v3249_v12 = vld [vmem:[%s4438_s3 + $0x190] ss:$8 sps:$4 sm:$0xff]  }
  0x40   :  { %1144 = vmatprep.subr.bf16.mxu1 %v3179_v29  ;;  %1071 = vmatprep.subr.bf16.mxu0 %v3194_v32  ;;  %v3254_v13 = vld [vmem:[%s4438_s3 + $0xb4] ss:$8 sps:$4 sm:$0xff]   ;;  %v3257_v14 = vld [vmem:[%s4438_s3 + $0x184] ss:$8 sps:$4 sm:$0xff]   ;;  %v3252_v15 = vld [vmem:[%s4438_s3 + $0xb0] ss:$8 sps:$4 sm:$0xff]  }
  0x41   :  { %2828 = vmatmul.mubr.msk.bf16.gmra.mxu0 %vm256_vm0, %v159_v31  ;;  %2830 = vmatmul.mubr.msk.bf16.gmra.mxu1 %vm256_vm0, %v159_v31  ;;  %v3255_v16 = vld [vmem:[%s4438_s3 + $0x180] ss:$8 sps:$4 sm:$0xff]   ;;  %v3260_v17 = vld [vmem:[%s4438_s3 + $0xa4] ss:$8 sps:$4 sm:$0xff]   ;;  %v3263_v19 = vld [vmem:[%s4438_s3 + $0x94] ss:$8 sps:$4 sm:$0xff]  }
  0x42   :  { %v3258_v18 = vld [vmem:[%s4438_s3 + $0xa0] ss:$8 sps:$4 sm:$0xff]   ;;  %v3261_v20 = vld [vmem:[%s4438_s3 + $0x90] ss:$8 sps:$4 sm:$0xff]   ;;  %v3266_v22 = vld [vmem:[%s4438_s3 + $0x84] ss:$8 sps:$4 sm:$0xff]  }
  0x43   :  { %1145 = vmatpush1.bf16.msra.mxu1 %v3177_v33  ;;  %1072 = vmatpush1.bf16.msra.mxu0 %v3192_v35  ;;  %v3264_v21 = vld [vmem:[%s4438_s3 + $0x80] ss:$8 sps:$4 sm:$0xff]   ;;  %v3269_v23 = vld [vmem:[%s4438_s3 + $0x274] ss:$8 sps:$4 sm:$0xff]   ;;  %v3879_v25 = vshrl.u32 %v77_v24, 7 }
  0x44   :  { %1146 = vmatprep.subr.bf16.mxu1 %v3185_v34  ;;  %1073 = vmatprep.subr.bf16.mxu0 %v3200_v36  ;;  %v369_v27 = vld [vmem:[%s4437_s2] sm:$0x3] }
  0x45   :  { %4460 = vst [vmem:[#allocation9_spill] sm:$0xff] %v3879_v25  ;;  %v3882_v26 = vsub.s32 0, %v3879_v25  ;;  %v3888_v28 = vsub.s32 1, %v3879_v25  ;;  %vm421_vm2 = vcmp.lt.s32.totalorder %v3879_v25, 1  ;;  %vm446_vm5 = vcmp.lt.s32.totalorder %v3879_v25, 7 }
  0x47   :  { %1147 = vmatpush1.bf16.msra.mxu1 %v3183_v37  ;;  %1074 = vmatpush1.bf16.msra.mxu0 %v3198_v39  ;;  %v374_v31 = vrot.slane %v369_v27, %v3882_v26  ;;  %v378_v33 = vrot.slane %v369_v27, %v3888_v28  ;;  %v3603_v27 = vmov 0.0  }
  0x48   :  { %1148 = vmatprep.subr.bf16.mxu1 %v3191_v38  ;;  %1075 = vmatprep.subr.bf16.mxu0 %v3206_v40 }
  0x4b   :  { %1149 = vmatpush1.bf16.msra.mxu1 %v3189_v41  ;;  %1076 = vmatpush1.bf16.msra.mxu0 %v3204_v43 }
  0x4c   :  { %1150 = vmatprep.subr.bf16.mxu1 %v3197_v42  ;;  %1077 = vmatprep.subr.bf16.mxu0 %v3212_v44 }
  0x4f   :  { %1151 = vmatpush1.bf16.msra.mxu1 %v3195_v45  ;;  %1078 = vmatpush1.bf16.msra.mxu0 %v3210_v47 }
  0x50   :  { %1152 = vmatprep.subr.bf16.mxu1 %v3203_v46  ;;  %1079 = vmatprep.subr.bf16.mxu0 %v3218_v48 }
  0x53   :  { %1153 = vmatpush1.bf16.msra.mxu1 %v3201_v49  ;;  %1080 = vmatpush1.bf16.msra.mxu0 %v3216_v51  ;;  %v86_v51 = vand.u32 15, %v3879_v25 }
  0x54   :  { %1154 = vmatprep.subr.bf16.mxu1 %v3209_v50  ;;  %1081 = vmatprep.subr.bf16.mxu0 %v3224_v52 }
  0x55   :  { %vm3914_vm1 = vcmp.ne.s32.totalorder %v86_v51, 0  ;;  %v3267_v51 = vld [vmem:[%s4438_s3 + $0x270] ss:$8 sps:$4 sm:$0xff]  }
  0x57   :  { %1155 = vmatpush1.bf16.msra.mxu1 %v3207_v53  ;;  %1082 = vmatpush1.bf16.msra.mxu0 %v3222_v55 }
  0x58   :  { %1156 = vmatprep.subr.bf16.mxu1 %v3215_v54  ;;  %1083 = vmatprep.subr.bf16.mxu0 %v3230_v56 }
  0x5b   :  { %1157 = vmatpush2.bf16.msra.mxu1 %v3213_v57  ;;  %1084 = vmatpush2.bf16.msra.mxu0 %v3228_v59 }
  0x5c   :  { %1158 = vmatprep.subr.bf16.mxu1 %v3221_v58  ;;  %1085 = vmatprep.subr.bf16.mxu0 %v3236_v60  ;;  %v80_v58 = vadd.s32 16, %v3879_v25 }
  0x5f   :  { %1159 = vmatpush2.bf16.msra.mxu1 %v3219_v61  ;;  %1086 = vmatpush2.bf16.msra.mxu0 %v3234_v63 }
  0x60   :  { %1160 = vmatprep.subr.bf16.mxu1 %v3227_v62  ;;  %1087 = vmatprep.subr.bf16.mxu0 %v3242_v5 }
  0x63   :  { %1161 = vmatpush2.bf16.msra.mxu1 %v3225_v0  ;;  %1088 = vmatpush2.bf16.msra.mxu0 %v3240_v7 }
  0x64   :  { %1162 = vmatprep.subr.bf16.mxu1 %v3233_v1  ;;  %1089 = vmatprep.subr.bf16.mxu0 %v3248_v9 }
  0x67   :  { %1163 = vmatpush2.bf16.msra.mxu1 %v3231_v2  ;;  %1090 = vmatpush2.bf16.msra.mxu0 %v3246_v11 }
  0x68   :  { %1164 = vmatprep.subr.bf16.mxu1 %v3239_v3  ;;  %1091 = vmatprep.subr.bf16.mxu0 %v3254_v13  ;;  %v3273_v3 = vld [vmem:[%s4438_s3 + $0x250] ss:$8 sps:$4 sm:$0xff]  }
  0x6b   :  { %1165 = vmatpush2.bf16.msra.mxu1 %v3237_v4  ;;  %1092 = vmatpush2.bf16.msra.mxu0 %v3252_v15 }
  0x6c   :  { %1166 = vmatprep.subr.bf16.mxu1 %v3245_v6  ;;  %1093 = vmatprep.subr.bf16.mxu0 %v3260_v17 }
  0x6f   :  { %1167 = vmatpush2.bf16.msra.mxu1 %v3243_v8  ;;  %1094 = vmatpush2.bf16.msra.mxu0 %v3258_v18  ;;  %v100_v18 = vand.u32 15, %v80_v58  ;;  %v3270_v58 = vld [vmem:[%s4438_s3 + $0x260] ss:$8 sps:$4 sm:$0xff]  }
  0x70   :  { %1168 = vmatprep.subr.bf16.mxu1 %v3251_v10  ;;  %1095 = vmatprep.subr.bf16.mxu0 %v3263_v19 }
  0x71   :  { %vm132_vm3 = vcmp.ne.s32.totalorder %v100_v18, 0  ;;  %v3287_v18 = vld [vmem:[%s4438_s3 + $0x214] ss:$8 sps:$4 sm:$0xff]  }
  0x73   :  { %1169 = vmatpush2.bf16.msra.mxu1 %v3249_v12  ;;  %1096 = vmatpush2.bf16.msra.mxu0 %v3261_v20 }
  0x74   :  { %1170 = vmatprep.subr.bf16.mxu1 %v3257_v14  ;;  %1097 = vmatprep.subr.bf16.mxu0 %v3266_v22 }
  0x77   :  { %1171 = vmatpush2.bf16.msra.mxu1 %v3255_v16  ;;  %1098 = vmatpush2.bf16.msra.mxu0 %v3264_v21 }
  0x78   :  { %1213 = vmatprep.subr.bf16.mxu0 %v3269_v23 }
  0xf9   :  { %v297_v29 = vpop.f32.mrf.mxu0  ;;  %v350_v30 = vpop.f32.mrf.mxu1 }
  0xfa   :  { %v381_v35 = vadd.f32 %v374_v31, %v297_v29  ;;  %v397_v43 = vadd.f32 %v374_v31, %v350_v30  ;;  %v3947_v29 = vsel %vm3914_vm1, 1.0, %v3603_v27 }
  0xfb   :  { %v299_v32 = vpop.f32.mrf.mxu0  ;;  %v352_v34 = vpop.f32.mrf.mxu1  ;;  %4470 = vst [vmem:[#allocation17_spill] sm:$0xff] %v3947_v29 }
  0xfc   :  { %v382_v36 = vadd.f32 %v378_v33, %v299_v32  ;;  %v3892_v42 = vmax.f32 %v381_v35, 0.0  ;;  %v398_v49 = vadd.f32 %v378_v33, %v352_v34  ;;  %v3901_v56 = vmax.f32 %v397_v43, 0.0 }
  0xfd   :  { %v301_v37 = vpop.f32.mrf.mxu0  ;;  %v354_v38 = vpop.f32.mrf.mxu1  ;;  %v3973_v43 = vsel %vm132_vm3, 1.0, %v3603_v27 }
  0xfe   :  { %v383_v39 = vadd.f32 %v374_v31, %v301_v37  ;;  %v3894_v45 = vmax.f32 %v382_v36, 0.0  ;;  %v399_v59 = vadd.f32 %v374_v31, %v354_v38  ;;  %v3912_v1 = vmax.f32 %v398_v49, 0.0  ;;  %4472 = vst [vmem:[#allocation19_spill] sm:$0xff] %v3973_v43 }
  0xff   :  { %v303_v40 = vpop.f32.mrf.mxu0  ;;  %v356_v41 = vpop.f32.mrf.mxu1  ;;  %v413_v15 = vrot.slane %v3901_v56, 7 }
 0x100   :  { %v384_v44 = vadd.f32 %v378_v33, %v303_v40  ;;  %v3896_v46 = vmax.f32 %v383_v39, 0.0  ;;  %v400_v52 = vadd.f32 %v378_v33, %v356_v41  ;;  %v3933_v16 = vmax.f32 %v399_v59, 0.0 }
 0x101   :  { %v307_v47 = vpop.f32.mrf.mxu0  ;;  %v360_v48 = vpop.f32.mrf.mxu1  ;;  %v414_v23 = vrot.slane %v3912_v1, 7 }
 0x102   :  { %v3898_v50 = vmax.f32 %v384_v44, 0.0  ;;  %v385_v53 = vadd.f32 %v374_v31, %v307_v47  ;;  %v3905_v57 = vpack.c.bf16 %v3896_v46, %v3892_v42  ;;  %v3918_v5 = vmax.f32 %v400_v52, 0.0 }
 0x103   :  { %v309_v54 = vpop.f32.mrf.mxu0  ;;  %v362_v55 = vpop.f32.mrf.mxu1  ;;  %v401_v17 = vadd.f32 %v374_v31, %v360_v48  ;;  %v415_v34 = vrot.slane %v3933_v16, 7 }
 0x104   :  { %v386_v60 = vadd.f32 %v378_v33, %v309_v54  ;;  %v402_v61 = vadd.f32 %v378_v33, %v362_v55  ;;  %v3910_v0 = vpack.c.bf16 %v3898_v50, %v3894_v45  ;;  %v3920_v6 = vmax.f32 %v385_v53, 0.0  ;;  %v3272_v54 = vld [vmem:[%s4438_s3 + $0x264] ss:$8 sps:$4 sm:$0xff]  }
 0x105   :  { %v311_v62 = vpop.f32.mrf.mxu0  ;;  %v364_v63 = vpop.f32.mrf.mxu1  ;;  %v416_v24 = vrot.slane %v3918_v5, 7  ;;  %v3959_v35 = vmax.f32 %v401_v17, 0.0  ;;  %v468_v39 = vpack.c.bf16 %v3918_v5, %v3912_v1  ;;  %v426_v47 = vsel %vm421_vm2, %v413_v15, %v415_v34  ;;  %v3282_v17 = vld [vmem:[%s4438_s3 + $0x220] ss:$8 sps:$4 sm:$0xff]  }
 0x106   :  { %v387_v2 = vadd.f32 %v374_v31, %v311_v62  ;;  %v403_v4 = vadd.f32 %v374_v31, %v364_v63  ;;  %4463 = vst [vmem:[#allocation10_spill] sm:$0xff] %v3920_v6  ;;  %v3922_v7 = vmax.f32 %v386_v60, 0.0  ;;  %v3924_v8 = vmax.f32 %v402_v61, 0.0  ;;  %1172 = vmatprep.mubr.bf16.mxu1 %v3910_v0  ;;  %v3275_v61 = vld [vmem:[%s4438_s3 + $0x254] ss:$8 sps:$4 sm:$0xff]  }
 0x107   :  { %v313_v9 = vpop.f32.mrf.mxu0  ;;  %v366_v10 = vpop.f32.mrf.mxu1  ;;  %1173 = vmatmul.mubr.bf16.vlgmr.msra.gmra.mxu1 %v3905_v57  ;;  %4471 = vst [vmem:[#allocation18_spill] sm:$0xff] %v3959_v35  ;;  %v427_v41 = vsel %vm421_vm2, %v414_v23, %v416_v24  ;;  %v417_v48 = vrot.slane %v3959_v35, 7  ;;  %v3994_v60 = vpack.c.bf16 %v3933_v16, %v3901_v56 }
 0x108   :  { %4464 = vst [vmem:[#allocation11_spill] sm:$0xff] %v3922_v7  ;;  %4465 = vst [vmem:[#allocation12_spill] sm:$0xff] %v3924_v8  ;;  %v3927_v11 = vmax.f32 %v387_v2, 0.0  ;;  %v3929_v12 = vmax.f32 %v403_v4, 0.0  ;;  %v388_v13 = vadd.f32 %v378_v33, %v313_v9  ;;  %v404_v14 = vadd.f32 %v378_v33, %v366_v10  ;;  %v3278_v9 = vld [vmem:[%s4438_s3 + $0x244] ss:$8 sps:$4 sm:$0xff]  }
 0x109   :  { %v418_v19 = vrot.slane %v3924_v8, 7  ;;  %v424_v59 = vsel %vm421_vm2, %v415_v34, %v417_v48  ;;  %v3276_v10 = vld [vmem:[%s4438_s3 + $0x240] ss:$8 sps:$4 sm:$0xff]   ;;  %v3302_v34 = vld [vmem:[%s4438_s3 + $0x2c4] ss:$8 sps:$4 sm:$0xff]  }
 0x10a   :  { %4466 = vst [vmem:[#allocation13_spill] sm:$0xff] %v3927_v11  ;;  %4467 = vst [vmem:[#allocation14_spill] sm:$0xff] %v3929_v12  ;;  %v419_v20 = vrot.slane %v3929_v12, 7  ;;  %v3937_v21 = vmax.f32 %v388_v13, 0.0  ;;  %v3939_v22 = vmax.f32 %v404_v14, 0.0  ;;  %v3956_v33 = vpack.c.bf16 %v3927_v11, %v3920_v6 }
 0x10b   :  { %v425_v38 = vsel %vm421_vm2, %v416_v24, %v418_v19  ;;  %v434_v2 = vmul.f32 %v3973_v43, %v424_v59  ;;  %v4020_v13 = vpack.c.bf16 %v3929_v12, %v3959_v35  ;;  %v3281_v14 = vld [vmem:[%s4438_s3 + $0x234] ss:$8 sps:$4 sm:$0xff]   ;;  %v3291_v24 = vld [vmem:[%s4438_s3 + $0x2f0] ss:$8 sps:$4 sm:$0xff]  }
 0x10c   :  { %4468 = vst [vmem:[#allocation15_spill] sm:$0xff] %v3937_v21  ;;  %4469 = vst [vmem:[#allocation16_spill] sm:$0xff] %v3939_v22  ;;  %v428_v30 = vsel %vm421_vm2, %v419_v20, %v413_v15  ;;  %v420_v31 = vrot.slane %v3939_v22, 7  ;;  %v472_v32 = vpack.c.bf16 %v3937_v21, %v3922_v7  ;;  %v435_v52 = vmul.f32 %v3973_v43, %v425_v38  ;;  %v3279_v15 = vld [vmem:[%s4438_s3 + $0x230] ss:$8 sps:$4 sm:$0xff]  }
 0x10d   :  { %v430_v36 = vmul.f32 %v3947_v29, %v428_v30  ;;  %v4001_v62 = vpack.c.bf16 %v3939_v22, %v3924_v8  ;;  %v422_v63 = vsel %vm421_vm2, %v417_v48, %v419_v20  ;;  %v3288_v20 = vld [vmem:[%s4438_s3 + $0x200] ss:$8 sps:$4 sm:$0xff]   ;;  %v3296_v30 = vld [vmem:[%s4438_s3 + $0x2e4] ss:$8 sps:$4 sm:$0xff]   ;;  %v3303_v38 = vld [vmem:[%s4438_s3 + $0x2b0] ss:$8 sps:$4 sm:$0xff]  }
 0x10e   :  { %1182 = vmatprep.mubr.bf16.mxu1 %v472_v32  ;;  %v429_v37 = vsel %vm421_vm2, %v420_v31, %v414_v23  ;;  %v423_v44 = vsel %vm421_vm2, %v418_v19, %v420_v31  ;;  %v469_v4 = vpack.c.bf16 %v422_v63, %v434_v2  ;;  %v3285_v19 = vld [vmem:[%s4438_s3 + $0x210] ss:$8 sps:$4 sm:$0xff]   ;;  %v3293_v23 = vld [vmem:[%s4438_s3 + $0x2f4] ss:$8 sps:$4 sm:$0xff]   ;;  %v3294_v31 = vld [vmem:[%s4438_s3 + $0x2e0] ss:$8 sps:$4 sm:$0xff]  }
 0x10f   :  { %v431_v40 = vmul.f32 %v3947_v29, %v429_v37  ;;  %1183 = vmatmul.mubr.bf16.gmra.mxu1 %v3956_v33  ;;  %v463_v53 = vpack.c.bf16 %v426_v47, %v430_v36  ;;  %v470_v55 = vpack.c.bf16 %v423_v44, %v435_v52  ;;  %v3300_v36 = vld [vmem:[%s4438_s3 + $0x2c0] ss:$8 sps:$4 sm:$0xff]   ;;  %v3305_v37 = vld [vmem:[%s4438_s3 + $0x2b4] ss:$8 sps:$4 sm:$0xff]   ;;  %v3309_v44 = vld [vmem:[%s4438_s3 + $0x290] ss:$8 sps:$4 sm:$0xff]  }
 0x110   :  { %1192 = vmatprep.mubr.bf16.mxu1 %v468_v39  ;;  %v79_v47 = vadd.s32 8, %v3879_v25  ;;  %v3314_v48 = vld [vmem:[%s4438_s3 + $0x284] ss:$8 sps:$4 sm:$0xff]   ;;  %v441_v52 = vrot.slane %v3898_v50, 1  ;;  %v440_v63 = vrot.slane %v3896_v46, 1  ;;  %v442_v2 = vrot.slane %v3920_v6, 1 }
 0x111   :  { %v464_v49 = vpack.c.bf16 %v427_v41, %v431_v40  ;;  %v3306_v40 = vld [vmem:[%s4438_s3 + $0x2a0] ss:$8 sps:$4 sm:$0xff]   ;;  %v3311_v41 = vld [vmem:[%s4438_s3 + $0x294] ss:$8 sps:$4 sm:$0xff]  }
 0x113   :  { %1099 = vmatprep.mubr.bf16.mxu0 %v464_v49  ;;  %v3312_v49 = vld [vmem:[%s4438_s3 + $0x280] ss:$8 sps:$4 sm:$0xff]  }
 0x114   :  { %1100 = vmatmul.mubr.bf16.vlgmr.msra.gmra.mxu0 %v463_v53  ;;  %v443_v53 = vrot.slane %v3922_v7, 1 }
 0x115   :  { %1214 = vmatpush1.bf16.msra.mxu0 %v3267_v51  ;;  %1109 = vmatprep.mubr.bf16.mxu0 %v470_v55  ;;  %v93_v51 = vand.u32 15, %v79_v47  ;;  %v439_v55 = vrot.slane %v3894_v45, 1  ;;  %v3336_v47 = vld [vmem:[#allocation4 + $0x70] ss:$8 sps:$4 sm:$0xff]  }
 0x116   :  { %1215 = vmatprep.subr.bf16.mxu0 %v3272_v54  ;;  %v81_v54 = vadd.s32 24, %v3879_v25  ;;  %v450_v59 = vsel %vm446_vm5, %v441_v52, %v443_v53 }
 0x117   :  { %1193 = vmatmul.mubr.bf16.gmra.mxu1 %v3994_v60  ;;  %vm143_vm4 = vcmp.ne.s32.totalorder %v93_v51, 15  ;;  %v3335_v51 = vld [vmem:[#allocation4 + $0x114] ss:$8 sps:$4 sm:$0xff]  }
 0x118   :  { %1202 = vmatprep.mubr.bf16.mxu1 %v4001_v62 }
 0x119   :  { %1216 = vmatpush1.bf16.msra.mxu0 %v3270_v58  ;;  %v4105_v58 = vsel %vm143_vm4, 1.0, %v3603_v27 }
 0x11a   :  { %1217 = vmatprep.subr.bf16.mxu0 %v3275_v61  ;;  %4473 = vst [vmem:[#allocation20_spill] sm:$0xff] %v4105_v58  ;;  %v107_v61 = vand.u32 15, %v81_v54  ;;  %v3350_v54 = vld [vmem:[#allocation4 + $0x54] ss:$8 sps:$4 sm:$0xff]  }
 0x11c   :  { %1110 = vmatmul.mubr.bf16.gmra.mxu0 %v469_v4  ;;  %v445_v4 = vrot.slane %v3937_v21, 1  ;;  %vm145_vm6 = vcmp.ne.s32.totalorder %v107_v61, 15  ;;  %v3348_v61 = vld [vmem:[#allocation4 + $0x50] ss:$8 sps:$4 sm:$0xff]  }
 0x11d   :  { %1218 = vmatpush1.bf16.msra.mxu0 %v3273_v3  ;;  %1119 = vmatprep.mubr.bf16.mxu0 %v3910_v0  ;;  %v3284_v0 = vld [vmem:[%s4438_s3 + $0x224] ss:$8 sps:$4 sm:$0xff]   ;;  %v458_v3 = vmul.f32 %v4105_v58, %v450_v59 }
 0x11e   :  { %1219 = vmatprep.subr.bf16.mxu0 %v3278_v9  ;;  %v438_v9 = vrot.slane %v3892_v42, 1  ;;  %v3341_v59 = vld [vmem:[#allocation4 + $0x104] ss:$8 sps:$4 sm:$0xff]  }
 0x11f   :  { %1203 = vmatmul.mubr.bf16.gmra.mxu1 %v4020_v13 }
 0x121   :  { %1220 = vmatpush1.bf16.msra.mxu0 %v3276_v10 }
 0x122   :  { %1221 = vmatprep.subr.bf16.mxu0 %v3281_v14  ;;  %v449_v14 = vsel %vm446_vm5, %v440_v63, %v442_v2 }
 0x124   :  { %1120 = vmatmul.mubr.bf16.gmra.mxu0 %v3905_v57  ;;  %v3290_v57 = vld [vmem:[%s4438_s3 + $0x204] ss:$8 sps:$4 sm:$0xff]  }
 0x125   :  { %1222 = vmatpush1.bf16.msra.mxu0 %v3279_v15  ;;  %1129 = vmatprep.mubr.bf16.mxu0 %v472_v32  ;;  %v3299_v32 = vld [vmem:[%s4438_s3 + $0x2d4] ss:$8 sps:$4 sm:$0xff]   ;;  %v454_v15 = vsel %vm446_vm5, %v445_v4, %v439_v55 }
 0x126   :  { %1223 = vmatprep.subr.bf16.mxu0 %v3284_v0  ;;  %v457_v0 = vmul.f32 %v4105_v58, %v449_v14  ;;  %v3360_v14 = vld [vmem:[#allocation4 + $0x30] ss:$8 sps:$4 sm:$0xff]  }
 0x129   :  { %1224 = vmatpush1.bf16.msra.mxu0 %v3282_v17  ;;  %v444_v17 = vrot.slane %v3927_v11, 1 }
 0x12a   :  { %1225 = vmatprep.subr.bf16.mxu0 %v3287_v18  ;;  %v451_v18 = vsel %vm446_vm5, %v438_v9, %v440_v63  ;;  %v3356_v63 = vld [vmem:[#allocation4 + $0x44] ss:$8 sps:$4 sm:$0xff]  }
 0x12c   :  { %1130 = vmatmul.mubr.bf16.gmra.mxu0 %v3956_v33  ;;  %v3297_v33 = vld [vmem:[%s4438_s3 + $0x2d0] ss:$8 sps:$4 sm:$0xff]  }
 0x12d   :  { %1226 = vmatpush1.bf16.msra.mxu0 %v3285_v19  ;;  %1245 = vmatprep.mubr.bf16.mxu0 %v468_v39  ;;  %v3308_v39 = vld [vmem:[%s4438_s3 + $0x2a4] ss:$8 sps:$4 sm:$0xff]  }
 0x12e   :  { %1227 = vmatprep.subr.bf16.mxu0 %v3290_v57  ;;  %v448_v57 = vsel %vm446_vm5, %v443_v53, %v445_v4  ;;  %v3342_v53 = vld [vmem:[#allocation4 + $0x60] ss:$8 sps:$4 sm:$0xff]  }
 0x12f   :  { %v3354_v4 = vld [vmem:[#allocation4 + $0x40] ss:$8 sps:$4 sm:$0xff]  }
 0x131   :  { %1228 = vmatpush1.bf16.msra.mxu0 %v3288_v20  ;;  %v3315_v20 = vld [vmem:[#allocation4 + $0x170] ss:$8 sps:$4 sm:$0xff]  }
 0x132   :  { %1229 = vmatprep.subr.bf16.mxu0 %v3293_v23 }
 0x135   :  { %1230 = vmatpush2.bf16.msra.mxu0 %v3291_v24  ;;  %v453_v24 = vsel %vm446_vm5, %v444_v17, %v438_v9  ;;  %v3345_v9 = vld [vmem:[#allocation4 + $0x1f0] ss:$8 sps:$4 sm:$0xff]  }
 0x136   :  { %1231 = vmatprep.subr.bf16.mxu0 %v3296_v30 }
 0x139   :  { %1232 = vmatpush2.bf16.msra.mxu0 %v3294_v31  ;;  %v3318_v31 = vld [vmem:[#allocation4 + $0x160] ss:$8 sps:$4 sm:$0xff]  }
 0x13a   :  { %1233 = vmatprep.subr.bf16.mxu0 %v3299_v32  ;;  %v3320_v32 = vld [vmem:[#allocation4 + $0x164] ss:$8 sps:$4 sm:$0xff]  }
 0x13d   :  { %1234 = vmatpush2.bf16.msra.mxu0 %v3297_v33  ;;  %v447_v33 = vsel %vm446_vm5, %v442_v2, %v444_v17  ;;  %v3339_v2 = vld [vmem:[#allocation4 + $0x100] ss:$8 sps:$4 sm:$0xff]   ;;  %v3359_v17 = vld [vmem:[#allocation4 + $0x1d4] ss:$8 sps:$4 sm:$0xff]  }
 0x13e   :  { %1235 = vmatprep.subr.bf16.mxu0 %v3302_v34  ;;  %v3321_v34 = vld [vmem:[#allocation4 + $0x150] ss:$8 sps:$4 sm:$0xff]  }
 0x141   :  { %1236 = vmatpush2.bf16.msra.mxu0 %v3300_v36  ;;  %v3323_v36 = vld [vmem:[#allocation4 + $0x154] ss:$8 sps:$4 sm:$0xff]  }
 0x142   :  { %1237 = vmatprep.subr.bf16.mxu0 %v3305_v37 }
 0x145   :  { %1238 = vmatpush2.bf16.msra.mxu0 %v3303_v38  ;;  %v3324_v38 = vld [vmem:[#allocation4 + $0x140] ss:$8 sps:$4 sm:$0xff]  }
 0x146   :  { %1239 = vmatprep.subr.bf16.mxu0 %v3308_v39  ;;  %v3326_v39 = vld [vmem:[#allocation4 + $0x144] ss:$8 sps:$4 sm:$0xff]  }
 0x149   :  { %1240 = vmatpush2.bf16.msra.mxu0 %v3306_v40  ;;  %v3327_v40 = vld [vmem:[#allocation4 + $0x130] ss:$8 sps:$4 sm:$0xff]  }
 0x14a   :  { %1241 = vmatprep.subr.bf16.mxu0 %v3311_v41  ;;  %v3329_v41 = vld [vmem:[#allocation4 + $0x134] ss:$8 sps:$4 sm:$0xff]  }
 0x14d   :  { %1242 = vmatpush2.bf16.msra.mxu0 %v3309_v44  ;;  %v3332_v44 = vld [vmem:[#allocation4 + $0x124] ss:$8 sps:$4 sm:$0xff]  }
 0x14e   :  { %1243 = vmatprep.subr.bf16.mxu0 %v3314_v48  ;;  %v3338_v48 = vld [vmem:[#allocation4 + $0x74] ss:$8 sps:$4 sm:$0xff]  }
 0x14f   :  { %1954 = vmatprep.subr.bf16.mxu1 %v3338_v48  ;;  %v3393_v48 = vld [vmem:[#allocation4 + $0xd0] ss:$8 sps:$4 sm:$0xff]  }
 0x150   :  { %1955 = vmatpush1.bf16.msra.mxu1 %v3336_v47  ;;  %v3395_v47 = vld [vmem:[#allocation4 + $0xd4] ss:$8 sps:$4 sm:$0xff]  }
 0x151   :  { %1244 = vmatpush2.bf16.msra.mxu0 %v3312_v49  ;;  %v3330_v49 = vld [vmem:[#allocation4 + $0x120] ss:$8 sps:$4 sm:$0xff]  }
 0x154   :  { %1246 = vmatmul.mubr.bf16.vlgmr.msra.gmra.mxu0 %v3994_v60  ;;  %v452_v60 = vsel %vm446_vm5, %v439_v55, %v441_v52  ;;  %v3344_v52 = vld [vmem:[#allocation4 + $0x64] ss:$8 sps:$4 sm:$0xff]   ;;  %v3333_v55 = vld [vmem:[#allocation4 + $0x110] ss:$8 sps:$4 sm:$0xff]  }
 0x155   :  { %1255 = vmatprep.mubr.bf16.mxu0 %v4001_v62  ;;  %v476_v10 = vpack.c.bf16 %v458_v3, %v452_v60  ;;  %v4121_v62 = vsel %vm145_vm6, 1.0, %v3603_v27  ;;  %v3317_v27 = vld [vmem:[#allocation4 + $0x174] ss:$8 sps:$4 sm:$0xff]   ;;  %1956 = vmatprep.subr.bf16.mxu1 %v3344_v52 }
 0x156   :  { %4474 = vst [vmem:[#allocation21_spill] sm:$0xff] %v4121_v62  ;;  %v462_v19 = vmul.f32 %v4121_v62, %v454_v15  ;;  %2027 = vmatprep.subr.bf16.mxu0 %v3317_v27  ;;  %v461_v30 = vmul.f32 %v4121_v62, %v453_v24  ;;  %1957 = vmatpush1.bf16.msra.mxu1 %v3342_v53  ;;  %v3347_v3 = vld [vmem:[#allocation4 + $0x1f4] ss:$8 sps:$4 sm:$0xff]   ;;  %v3368_v15 = vld [vmem:[#allocation4 + $0x24] ss:$8 sps:$4 sm:$0xff]  }
 0x157   :  { %2028 = vmatpush1.bf16.msra.mxu0 %v3315_v20  ;;  %1958 = vmatprep.subr.bf16.mxu1 %v3350_v54  ;;  %v3362_v60 = vld [vmem:[#allocation4 + $0x34] ss:$8 sps:$4 sm:$0xff]   ;;  %v3369_v27 = vld [vmem:[#allocation4 + $0x1b0] ss:$8 sps:$4 sm:$0xff]   ;;  %v3377_v24 = vld [vmem:[#allocation4 + $0x1a4] ss:$8 sps:$4 sm:$0xff]  }
 0x158   :  { %v478_v23 = vpack.c.bf16 %v462_v19, %v448_v57  ;;  %2029 = vmatprep.subr.bf16.mxu0 %v3320_v32  ;;  %v477_v37 = vpack.c.bf16 %v461_v30, %v447_v33  ;;  %v3357_v19 = vld [vmem:[#allocation4 + $0x1d0] ss:$8 sps:$4 sm:$0xff]   ;;  %v3365_v57 = vld [vmem:[#allocation4 + $0x1c4] ss:$8 sps:$4 sm:$0xff]   ;;  %v3371_v20 = vld [vmem:[#allocation4 + $0x1b4] ss:$8 sps:$4 sm:$0xff]  }
 0x159   :  { %v3372_v30 = vld [vmem:[#allocation4 + $0x10] ss:$8 sps:$4 sm:$0xff]   ;;  %v3380_v32 = vld [vmem:[#allocation4 + $0x4] ss:$8 sps:$4 sm:$0xff]   ;;  %v3383_v33 = vld [vmem:[#allocation4 + $0x194] ss:$8 sps:$4 sm:$0xff]  }
 0x15a   :  { %1959 = vmatpush1.bf16.msra.mxu1 %v3348_v61  ;;  %v3401_v52 = vld [vmem:[#allocation4 + $0xb4] ss:$8 sps:$4 sm:$0xff]   ;;  %v3399_v53 = vld [vmem:[#allocation4 + $0xb0] ss:$8 sps:$4 sm:$0xff]   ;;  %v3404_v54 = vld [vmem:[#allocation4 + $0xa4] ss:$8 sps:$4 sm:$0xff]  }
 0x15b   :  { %2030 = vmatpush1.bf16.msra.mxu0 %v3318_v31  ;;  %1960 = vmatprep.subr.bf16.mxu1 %v3356_v63  ;;  %v3375_v31 = vld [vmem:[#allocation4 + $0x1a0] ss:$8 sps:$4 sm:$0xff]   ;;  %v3405_v61 = vld [vmem:[#allocation4 + $0x90] ss:$8 sps:$4 sm:$0xff]  }
 0x15c   :  { %1256 = vmatmul.mubr.bf16.gmra.mxu0 %v4020_v13  ;;  %v475_v13 = vpack.c.bf16 %v457_v0, %v451_v18  ;;  %2031 = vmatprep.subr.bf16.mxu0 %v3323_v36  ;;  %v3351_v0 = vld [vmem:[#allocation4 + $0x1e0] ss:$8 sps:$4 sm:$0xff]   ;;  %v3381_v36 = vld [vmem:[#allocation4 + $0x190] ss:$8 sps:$4 sm:$0xff]  }
 0x15d   :  { %1265 = vmatprep.mubr.bf16.mxu0 %v476_v10  ;;  %v3353_v10 = vld [vmem:[#allocation4 + $0x1e4] ss:$8 sps:$4 sm:$0xff]   ;;  %v3366_v18 = vld [vmem:[#allocation4 + $0x20] ss:$8 sps:$4 sm:$0xff]  }
 0x15e   :  { %1961 = vmatpush1.bf16.msra.mxu1 %v3354_v4  ;;  %v3408_v63 = vld [vmem:[#allocation4 + $0x80] ss:$8 sps:$4 sm:$0xff]  }
 0x15f   :  { %2032 = vmatpush1.bf16.msra.mxu0 %v3321_v34  ;;  %1962 = vmatprep.subr.bf16.mxu1 %v3362_v60  ;;  %v3378_v34 = vld [vmem:[#allocation4] ss:$8 sps:$4 sm:$0xff]  }
 0x160   :  { %2033 = vmatprep.subr.bf16.mxu0 %v3326_v39  ;;  %v3384_v39 = vld [vmem:[#allocation4 + $0xf0] ss:$8 sps:$4 sm:$0xff]  }
 0x162   :  { %1963 = vmatpush1.bf16.msra.mxu1 %v3360_v14 }
 0x163   :  { %2034 = vmatpush1.bf16.msra.mxu0 %v3324_v38  ;;  %1964 = vmatprep.subr.bf16.mxu1 %v3368_v15  ;;  %v3389_v38 = vld [vmem:[#allocation4 + $0x184] ss:$8 sps:$4 sm:$0xff]  }
 0x164   :  { %1266 = vmatmul.mubr.bf16.gmra.mxu0 %v475_v13  ;;  %2035 = vmatprep.subr.bf16.mxu0 %v3329_v41  ;;  %v3363_v13 = vld [vmem:[#allocation4 + $0x1c0] ss:$8 sps:$4 sm:$0xff]   ;;  %v3392_v41 = vld [vmem:[#allocation4 + $0xe4] ss:$8 sps:$4 sm:$0xff]  }
 0x165   :  { %1275 = vmatprep.mubr.bf16.mxu0 %v478_v23  ;;  %v3374_v23 = vld [vmem:[#allocation4 + $0x14] ss:$8 sps:$4 sm:$0xff]  }
 0x166   :  { %1965 = vmatpush1.bf16.msra.mxu1 %v3366_v18 }
 0x167   :  { %2036 = vmatpush1.bf16.msra.mxu0 %v3327_v40  ;;  %1966 = vmatprep.subr.bf16.mxu1 %v3374_v23  ;;  %v3387_v40 = vld [vmem:[#allocation4 + $0x180] ss:$8 sps:$4 sm:$0xff]  }
 0x168   :  { %2037 = vmatprep.subr.bf16.mxu0 %v3332_v44  ;;  %v3390_v44 = vld [vmem:[#allocation4 + $0xe0] ss:$8 sps:$4 sm:$0xff]  }
 0x16a   :  { %1967 = vmatpush1.bf16.msra.mxu1 %v3372_v30 }
 0x16b   :  { %2038 = vmatpush1.bf16.msra.mxu0 %v3330_v49  ;;  %1968 = vmatprep.subr.bf16.mxu1 %v3380_v32  ;;  %v3398_v49 = vld [vmem:[#allocation4 + $0xc4] ss:$8 sps:$4 sm:$0xff]  }
 0x16c   :  { %1276 = vmatmul.mubr.bf16.gmra.mxu0 %v477_v37  ;;  %2039 = vmatprep.subr.bf16.mxu0 %v3335_v51  ;;  %v3386_v37 = vld [vmem:[#allocation4 + $0xf4] ss:$8 sps:$4 sm:$0xff]   ;;  %v3396_v51 = vld [vmem:[#allocation4 + $0xc0] ss:$8 sps:$4 sm:$0xff]  }
 0x16e   :  { %1969 = vmatpush1.bf16.msra.mxu1 %v3378_v34 }
 0x16f   :  { %2040 = vmatpush1.bf16.msra.mxu0 %v3333_v55  ;;  %1970 = vmatprep.subr.bf16.mxu1 %v3386_v37  ;;  %v3402_v55 = vld [vmem:[#allocation4 + $0xa0] ss:$8 sps:$4 sm:$0xff]  }
 0x170   :  { %2041 = vmatprep.subr.bf16.mxu0 %v3341_v59  ;;  %v3407_v59 = vld [vmem:[#allocation4 + $0x94] ss:$8 sps:$4 sm:$0xff]  }
 0x172   :  { %1971 = vmatpush2.bf16.msra.mxu1 %v3384_v39 }
 0x173   :  { %2042 = vmatpush1.bf16.msra.mxu0 %v3339_v2  ;;  %1972 = vmatprep.subr.bf16.mxu1 %v3392_v41  ;;  %v3410_v2 = vld [vmem:[#allocation4 + $0x84] ss:$8 sps:$4 sm:$0xff]  }
 0x174   :  { %2043 = vmatprep.subr.bf16.mxu0 %v3347_v3  ;;  %v3413_v3 = vld [vmem:[#allocation4 + $0x274] ss:$8 sps:$4 sm:$0xff]  }
 0x176   :  { %1973 = vmatpush2.bf16.msra.mxu1 %v3390_v44 }
 0x177   :  { %2044 = vmatpush2.bf16.msra.mxu0 %v3345_v9  ;;  %1974 = vmatprep.subr.bf16.mxu1 %v3395_v47 }
 0x178   :  { %2045 = vmatprep.subr.bf16.mxu0 %v3353_v10 }
 0x17a   :  { %1975 = vmatpush2.bf16.msra.mxu1 %v3393_v48 }
 0x17b   :  { %2046 = vmatpush2.bf16.msra.mxu0 %v3351_v0  ;;  %1976 = vmatprep.subr.bf16.mxu1 %v3398_v49 }
 0x17c   :  { %2047 = vmatprep.subr.bf16.mxu0 %v3359_v17 }
 0x17e   :  { %1977 = vmatpush2.bf16.msra.mxu1 %v3396_v51 }
 0x17f   :  { %2048 = vmatpush2.bf16.msra.mxu0 %v3357_v19  ;;  %1978 = vmatprep.subr.bf16.mxu1 %v3401_v52 }
 0x180   :  { %2049 = vmatprep.subr.bf16.mxu0 %v3365_v57 }
 0x182   :  { %1979 = vmatpush2.bf16.msra.mxu1 %v3399_v53 }
 0x183   :  { %2050 = vmatpush2.bf16.msra.mxu0 %v3363_v13  ;;  %1980 = vmatprep.subr.bf16.mxu1 %v3404_v54 }
 0x184   :  { %2051 = vmatprep.subr.bf16.mxu0 %v3371_v20 }
 0x186   :  { %1981 = vmatpush2.bf16.msra.mxu1 %v3402_v55 }
 0x187   :  { %2052 = vmatpush2.bf16.msra.mxu0 %v3369_v27  ;;  %1982 = vmatprep.subr.bf16.mxu1 %v3407_v59 }
 0x188   :  { %2053 = vmatprep.subr.bf16.mxu0 %v3377_v24 }
 0x18a   :  { %1983 = vmatpush2.bf16.msra.mxu1 %v3405_v61 }
 0x18b   :  { %2054 = vmatpush2.bf16.msra.mxu0 %v3375_v31  ;;  %1984 = vmatprep.subr.bf16.mxu1 %v3410_v2 }
 0x18c   :  { %2055 = vmatprep.subr.bf16.mxu0 %v3383_v33  ;;  %v575_v33 = vld [vmem:[%s4439_s4] sm:$0x3] }
 0x18d   :  { %v4153_v37 = vrot.slane %v575_v33, %v3882_v26 }
 0x18e   :  { %1985 = vmatpush2.bf16.msra.mxu1 %v3408_v63 }
 0x18f   :  { %2056 = vmatpush2.bf16.msra.mxu0 %v3381_v36  ;;  %2100 = vmatprep.subr.bf16.mxu1 %v3413_v3 }
 0x190   :  { %2057 = vmatprep.subr.bf16.mxu0 %v3389_v38  ;;  %v4156_v38 = vrot.slane %v575_v33, %v3888_v28 }
 0x193   :  { %2058 = vmatpush2.bf16.msra.mxu0 %v3387_v40 }
 0x1c7   :  { %v1174_v18 = vpop.f32.mrf.mxu1 }
 0x1c9   :  { %v1176_v57 = vpop.f32.mrf.mxu1 }
 0x1cb   :  { %v1178_v20 = vpop.f32.mrf.mxu1 }
 0x1cd   :  { %v1180_v23 = vpop.f32.mrf.mxu1 }
 0x1cf   :  { %v1184_v30 = vpop.f32.mrf.mxu1 }
 0x1d1   :  { %v1186_v32 = vpop.f32.mrf.mxu1 }
 0x1d3   :  { %v1188_v36 = vpop.f32.mrf.mxu1 }
 0x1d4   :  { %v1101_v4 = vpop.f32.mrf.mxu0 }
 0x1d5   :  { %v1102_v40 = vadd.f32 %v1101_v4, %v4153_v37  ;;  %v1190_v41 = vpop.f32.mrf.mxu1 }
 0x1d6   :  { %v1103_v60 = vpop.f32.mrf.mxu0 }
 0x1d7   :  { %v1104_v44 = vadd.f32 %v1103_v60, %v4156_v38  ;;  %v1194_v49 = vpop.f32.mrf.mxu1  ;;  %v1175_v51 = vadd.f32 %v1174_v18, %v1102_v40 }
 0x1d8   :  { %v1105_v9 = vpop.f32.mrf.mxu0 }
 0x1d9   :  { %v1106_v48 = vadd.f32 %v1105_v9, %v4153_v37  ;;  %v1177_v54 = vadd.f32 %v1176_v57, %v1104_v44  ;;  %v1196_v3 = vpop.f32.mrf.mxu1 }
 0x1da   :  { %v1107_v10 = vpop.f32.mrf.mxu0 }
 0x1db   :  { %v1108_v53 = vadd.f32 %v1107_v10, %v4156_v38  ;;  %v1179_v2 = vadd.f32 %v1178_v20, %v1106_v48  ;;  %v1198_v44 = vpop.f32.mrf.mxu1 }
 0x1dc   :  { %v1111_v14 = vpop.f32.mrf.mxu0 }
 0x1dd   :  { %v1112_v61 = vadd.f32 %v1111_v14, %v4153_v37  ;;  %v1181_v6 = vadd.f32 %v1180_v23, %v1108_v53 }
 0x1de   :  { %v1113_v15 = vpop.f32.mrf.mxu0 }
 0x1df   :  { %v1114_v60 = vadd.f32 %v1113_v15, %v4156_v38  ;;  %v1185_v57 = vadd.f32 %v1184_v30, %v1112_v61 }
 0x1e0   :  { %v1115_v0 = vpop.f32.mrf.mxu0 }
 0x1e1   :  { %v1116_v9 = vadd.f32 %v1115_v0, %v4153_v37 }
 0x1e2   :  { %v1117_v17 = vpop.f32.mrf.mxu0 }
 0x1e3   :  { %v1189_v23 = vadd.f32 %v1188_v36, %v1116_v9 }
 0x1e4   :  { %v4137_v19 = vpop.f32.mrf.mxu0 }
 0x1e5   :  { %v1122_v9 = vadd.f32 %v4137_v19, %v4153_v37 }
 0x1e6   :  { %v4139_v13 = vpop.f32.mrf.mxu0 }
 0x1e8   :  { %v4141_v27 = vpop.f32.mrf.mxu0 }
 0x1ea   :  { %v4143_v24 = vpop.f32.mrf.mxu0 }
 0x1ec   :  { %v4145_v31 = vpop.f32.mrf.mxu0 }
 0x1ee   :  { %v4150_v34 = vpop.f32.mrf.mxu0 }
 0x1f0   :  { %v4158_v39 = vpop.f32.mrf.mxu0 }
 0x1f2   :  { %v4162_v47 = vpop.f32.mrf.mxu0 }
 0x214   :  { %v1247_v52 = vpop.f32.mrf.mxu0 }
 0x215   :  { %v1248_v55 = vadd.f32 %v1247_v52, %v1175_v51  ;;  %v1118_v51 = vadd.f32 %v1117_v17, %v4156_v38 }
 0x216   :  { %v1249_v59 = vpop.f32.mrf.mxu0 }
 0x217   :  { %v1250_v63 = vadd.f32 %v1249_v59, %v1177_v54  ;;  %v1286_v22 = vmax.f32 %v1248_v55, 0.0  ;;  %v1187_v54 = vadd.f32 %v1186_v32, %v1114_v60  ;;  %v1191_v61 = vadd.f32 %v1190_v41, %v1118_v51 }
 0x218   :  { %v1251_v4 = vpop.f32.mrf.mxu0  ;;  %v1128_v41 = vadd.f32 %v4143_v24, %v4156_v38 }
 0x219   :  { %v1252_v33 = vadd.f32 %v1251_v4, %v1179_v2  ;;  %v1287_v18 = vmax.f32 %v1250_v63, 0.0  ;;  %v1326_v59 = vrot.slane %v1286_v22, 1  ;;  %v1200_v4 = vpop.f32.mrf.mxu1 }
 0x21a   :  { %v1253_v40 = vpop.f32.mrf.mxu0 }
 0x21b   :  { %v1288_v21 = vmax.f32 %v1252_v33, 0.0  ;;  %v1254_v10 = vadd.f32 %v1253_v40, %v1181_v6  ;;  %v1327_v15 = vrot.slane %v1287_v18, 1 }
 0x21c   :  { %v1257_v14 = vpop.f32.mrf.mxu0 }
 0x21d   :  { %v1328_v52 = vrot.slane %v1288_v21, 1  ;;  %v1289_v20 = vmax.f32 %v1254_v10, 0.0  ;;  %v1258_v48 = vadd.f32 %v1257_v14, %v1185_v57  ;;  %v4172_v6 = vpack.c.bf16 %v1288_v21, %v1286_v22  ;;  %v1204_v14 = vpop.f32.mrf.mxu1 }
 0x21e   :  { %v1259_v2 = vpop.f32.mrf.mxu0  ;;  %v1124_v21 = vadd.f32 %v4139_v13, %v4156_v38  ;;  %v1126_v22 = vadd.f32 %v4141_v27, %v4153_v37  ;;  %v1195_v27 = vadd.f32 %v1194_v49, %v1122_v9 }
 0x21f   :  { %v1329_v53 = vrot.slane %v1289_v20, 1  ;;  %v4170_v0 = vpack.c.bf16 %v1289_v20, %v1287_v18  ;;  %v1290_v55 = vmax.f32 %v1258_v48, 0.0  ;;  %v1260_v63 = vadd.f32 %v1259_v2, %v1187_v54 }
 0x220   :  { %v1261_v30 = vpop.f32.mrf.mxu0  ;;  %v4176_v17 = vsel %vm446_vm5, %v1326_v59, %v1328_v52  ;;  %v1197_v54 = vadd.f32 %v1196_v3, %v1124_v21  ;;  %v1136_v21 = vadd.f32 %v4158_v39, %v4153_v37 }
 0x221   :  { %v1330_v33 = vrot.slane %v1290_v55, 1  ;;  %v1291_v32 = vmax.f32 %v1260_v63, 0.0  ;;  %v1262_v60 = vadd.f32 %v1261_v30, %v1189_v23  ;;  %2059 = vmatprep.mubr.bf16.mxu0 %v4170_v0  ;;  %v4181_v36 = vsel %vm446_vm5, %v1327_v15, %v1329_v53 }
 0x222   :  { %v1263_v18 = vpop.f32.mrf.mxu0  ;;  %2060 = vmatmul.mubr.bf16.vlgmr.msra.gmra.mxu0 %v4172_v6 }
 0x223   :  { %v1331_v40 = vrot.slane %v1291_v32, 1  ;;  %v1292_v10 = vmax.f32 %v1262_v60, 0.0  ;;  %v1264_v57 = vadd.f32 %v1263_v18, %v1191_v61  ;;  %v1336_v51 = vsel %vm446_vm5, %v1328_v52, %v1330_v33  ;;  %v1206_v60 = vpop.f32.mrf.mxu1 }
 0x224   :  { %v1267_v19 = vpop.f32.mrf.mxu0  ;;  %v4195_v20 = vmul.f32 %v4105_v58, %v1336_v51  ;;  %v1199_v52 = vadd.f32 %v1198_v44, %v1126_v22  ;;  %v1201_v61 = vadd.f32 %v1200_v4, %v1128_v41 }
 0x225   :  { %v1332_v13 = vrot.slane %v1292_v10, 1  ;;  %v1293_v48 = vmax.f32 %v1264_v57, 0.0  ;;  %v1337_v24 = vsel %vm446_vm5, %v1329_v53, %v1331_v40  ;;  %v4203_v18 = vpack.c.bf16 %v1292_v10, %v1290_v55 }
 0x226   :  { %v1269_v2 = vpop.f32.mrf.mxu0  ;;  %v1362_v23 = vpack.c.bf16 %v4195_v20, %v4176_v17  ;;  %v4206_v57 = vmul.f32 %v4105_v58, %v1337_v24  ;;  %v1134_v53 = vadd.f32 %v4150_v34, %v4156_v38  ;;  %v1268_v4 = vadd.f32 %v1267_v19, %v1195_v27  ;;  %v3470_v17 = vld [vmem:[#allocation6 + $0x44] ss:$8 sps:$4 sm:$0xff]   ;;  %v3468_v20 = vld [vmem:[#allocation6 + $0x40] ss:$8 sps:$4 sm:$0xff]  }
 0x227   :  { %v1333_v63 = vrot.slane %v1293_v48, 1  ;;  %v4201_v30 = vpack.c.bf16 %v1293_v48, %v1291_v32  ;;  %v4210_v49 = vsel %vm446_vm5, %v1330_v33, %v1332_v13  ;;  %v1340_v3 = vsel %vm446_vm5, %v1332_v13, %v1326_v59 }
 0x228   :  { %v1271_v51 = vpop.f32.mrf.mxu0  ;;  %v1270_v32 = vadd.f32 %v1269_v2, %v1197_v54  ;;  %v1363_v33 = vpack.c.bf16 %v4206_v57, %v4181_v36  ;;  %v4227_v34 = vmul.f32 %v4121_v62, %v1340_v3  ;;  %v1132_v10 = vadd.f32 %v4145_v31, %v4153_v37  ;;  %v3467_v36 = vld [vmem:[#allocation6 + $0x54] ss:$8 sps:$4 sm:$0xff]   ;;  %v3465_v57 = vld [vmem:[#allocation6 + $0x50] ss:$8 sps:$4 sm:$0xff]  }
 0x229   :  { %v1272_v44 = vadd.f32 %v1271_v51, %v1199_v52  ;;  %2069 = vmatprep.mubr.bf16.mxu0 %v4201_v30  ;;  %v4219_v55 = vsel %vm446_vm5, %v1331_v40, %v1333_v63  ;;  %v1341_v59 = vsel %vm446_vm5, %v1333_v63, %v1327_v15  ;;  %v1208_v40 = vpop.f32.mrf.mxu1  ;;  %v1138_v15 = vadd.f32 %v4162_v47, %v4156_v38 }
 0x22a   :  { %v1273_v9 = vpop.f32.mrf.mxu0  ;;  %2070 = vmatmul.mubr.bf16.gmra.mxu0 %v4203_v18  ;;  %v4232_v41 = vmul.f32 %v4121_v62, %v1341_v59  ;;  %v1295_v27 = vmax.f32 %v1270_v32, 0.0  ;;  %v1294_v2 = vmax.f32 %v1268_v4, 0.0  ;;  %v1207_v39 = vadd.f32 %v1206_v60, %v1134_v53 }
 0x22b   :  { %v1274_v22 = vadd.f32 %v1273_v9, %v1201_v61  ;;  %v1296_v19 = vmax.f32 %v1272_v44, 0.0  ;;  %v1209_v61 = vadd.f32 %v1208_v40, %v1136_v21  ;;  %v1210_v31 = vpop.f32.mrf.mxu1  ;;  %v1205_v51 = vadd.f32 %v1204_v14, %v1132_v10 }
 0x22c   :  { %v1277_v13 = vpop.f32.mrf.mxu0  ;;  %v1211_v38 = vadd.f32 %v1210_v31, %v1138_v15  ;;  %v1302_v59 = vrot.slane %v1294_v2, 7  ;;  %v1303_v48 = vrot.slane %v1295_v27, 7 }
 0x22d   :  { %v1297_v54 = vmax.f32 %v1274_v22, 0.0  ;;  %v4244_v37 = vpack.c.bf16 %v1296_v19, %v1294_v2  ;;  %v1278_v47 = vadd.f32 %v1277_v13, %v1205_v51  ;;  %v1304_v13 = vrot.slane %v1296_v19, 7 }
 0x22e   :  { %v1279_v24 = vpop.f32.mrf.mxu0 }
 0x22f   :  { %v4242_v52 = vpack.c.bf16 %v1297_v54, %v1295_v27  ;;  %v1280_v3 = vadd.f32 %v1279_v24, %v1207_v39  ;;  %v1298_v63 = vmax.f32 %v1278_v47, 0.0  ;;  %v1305_v14 = vrot.slane %v1297_v54, 7 }
 0x230   :  { %v1281_v44 = vpop.f32.mrf.mxu0  ;;  %v1314_v51 = vsel %vm421_vm2, %v1302_v59, %v1304_v13 }
 0x231   :  { %v1282_v9 = vadd.f32 %v1281_v44, %v1209_v61  ;;  %2079 = vmatprep.mubr.bf16.mxu0 %v4242_v52  ;;  %v1299_v32 = vmax.f32 %v1280_v3, 0.0  ;;  %v1315_v31 = vsel %vm421_vm2, %v1303_v48, %v1305_v14  ;;  %v1306_v3 = vrot.slane %v1298_v63, 7 }
 0x232   :  { %v1283_v60 = vpop.f32.mrf.mxu0  ;;  %2080 = vmatmul.mubr.bf16.gmra.mxu0 %v4244_v37 }
 0x233   :  { %v1300_v53 = vmax.f32 %v1282_v9, 0.0  ;;  %v1284_v4 = vadd.f32 %v1283_v60, %v1211_v38  ;;  %v1307_v22 = vrot.slane %v1299_v32, 7  ;;  %v3411_v9 = vld [vmem:[#allocation4 + $0x270] ss:$8 sps:$4 sm:$0xff]  }
 0x235   :  { %v1308_v21 = vrot.slane %v1300_v53, 7  ;;  %v1301_v40 = vmax.f32 %v1284_v4, 0.0  ;;  %v4252_v15 = vpack.c.bf16 %v1300_v53, %v1298_v63  ;;  %v1313_v27 = vsel %vm421_vm2, %v1305_v14, %v1307_v22  ;;  %v3414_v53 = vld [vmem:[#allocation4 + $0x260] ss:$8 sps:$4 sm:$0xff]   ;;  %v3419_v4 = vld [vmem:[#allocation4 + $0x254] ss:$8 sps:$4 sm:$0xff]  }
 0x236   :  { %v1323_v38 = vmul.f32 %v3973_v43, %v1313_v27  ;;  %v3422_v14 = vld [vmem:[#allocation4 + $0x244] ss:$8 sps:$4 sm:$0xff]   ;;  %v3429_v27 = vld [vmem:[#allocation4 + $0x210] ss:$8 sps:$4 sm:$0xff]  }
 0x237   :  { %v1316_v10 = vsel %vm421_vm2, %v1308_v21, %v1302_v59  ;;  %v1309_v39 = vrot.slane %v1301_v40, 7  ;;  %v4250_v24 = vpack.c.bf16 %v1301_v40, %v1299_v32  ;;  %v3416_v32 = vld [vmem:[#allocation4 + $0x264] ss:$8 sps:$4 sm:$0xff]   ;;  %v1310_v63 = vsel %vm421_vm2, %v1306_v3, %v1308_v21  ;;  %v3426_v21 = vld [vmem:[#allocation4 + $0x220] ss:$8 sps:$4 sm:$0xff]  }
 0x238   :  { %v1318_v61 = vmul.f32 %v3947_v29, %v1316_v10  ;;  %v3420_v10 = vld [vmem:[#allocation4 + $0x240] ss:$8 sps:$4 sm:$0xff]  }
 0x239   :  { %2089 = vmatprep.mubr.bf16.mxu0 %v4250_v24  ;;  %v1317_v2 = vsel %vm421_vm2, %v1309_v39, %v1303_v48  ;;  %v1311_v19 = vsel %vm421_vm2, %v1307_v22, %v1309_v39  ;;  %v1312_v48 = vsel %vm421_vm2, %v1304_v13, %v1306_v3  ;;  %v3417_v22 = vld [vmem:[#allocation4 + $0x250] ss:$8 sps:$4 sm:$0xff]   ;;  %v3425_v39 = vld [vmem:[#allocation4 + $0x234] ss:$8 sps:$4 sm:$0xff]  }
 0x23a   :  { %2090 = vmatmul.mubr.bf16.gmra.mxu0 %v4252_v15  ;;  %v1319_v54 = vmul.f32 %v3947_v29, %v1317_v2  ;;  %v1350_v47 = vpack.c.bf16 %v1314_v51, %v1318_v61  ;;  %v1357_v60 = vpack.c.bf16 %v1311_v19, %v1323_v38  ;;  %v1322_v59 = vmul.f32 %v3973_v43, %v1312_v48  ;;  %v3423_v13 = vld [vmem:[#allocation4 + $0x230] ss:$8 sps:$4 sm:$0xff]   ;;  %v3428_v61 = vld [vmem:[#allocation4 + $0x224] ss:$8 sps:$4 sm:$0xff]   ;;  %v3431_v2 = vld [vmem:[#allocation4 + $0x214] ss:$8 sps:$4 sm:$0xff]  }
 0x23b   :  { %v3440_v19 = vld [vmem:[#allocation4 + $0x2e4] ss:$8 sps:$4 sm:$0xff]   ;;  %v3443_v51 = vld [vmem:[#allocation4 + $0x2d4] ss:$8 sps:$4 sm:$0xff]   ;;  %v3441_v3 = vld [vmem:[#allocation4 + $0x2d0] ss:$8 sps:$4 sm:$0xff]  }
 0x23c   :  { %v1351_v44 = vpack.c.bf16 %v1315_v31, %v1319_v54  ;;  %v1356_v40 = vpack.c.bf16 %v1310_v63, %v1322_v59  ;;  %v3434_v54 = vld [vmem:[#allocation4 + $0x204] ss:$8 sps:$4 sm:$0xff]   ;;  %v3437_v31 = vld [vmem:[#allocation4 + $0x2f4] ss:$8 sps:$4 sm:$0xff]   ;;  %v3456_v48 = vld [vmem:[#allocation4 + $0x280] ss:$8 sps:$4 sm:$0xff]   ;;  %v4476_v63 = vpack.c.bf16 %v4227_v34, %v4210_v49 }
 0x23d   :  { %v3452_v38 = vld [vmem:[#allocation4 + $0x2a4] ss:$8 sps:$4 sm:$0xff]   ;;  %v3479_v34 = vld [vmem:[#allocation6 + $0x14] ss:$8 sps:$4 sm:$0xff]  }
 0x23e   :  { %1986 = vmatprep.mubr.bf16.mxu1 %v1351_v44  ;;  %v3446_v44 = vld [vmem:[#allocation4 + $0x2c4] ss:$8 sps:$4 sm:$0xff]  }
 0x23f   :  { %1987 = vmatmul.mubr.bf16.vlgmr.msra.gmra.mxu1 %v1350_v47  ;;  %v3450_v47 = vld [vmem:[#allocation4 + $0x2a0] ss:$8 sps:$4 sm:$0xff]   ;;  %v3464_v59 = vld [vmem:[#allocation6 + $0x64] ss:$8 sps:$4 sm:$0xff]  }
 0x240   :  { %2101 = vmatpush1.bf16.msra.mxu1 %v3411_v9  ;;  %1996 = vmatprep.mubr.bf16.mxu1 %v1357_v60  ;;  %v3449_v9 = vld [vmem:[#allocation4 + $0x2b4] ss:$8 sps:$4 sm:$0xff]   ;;  %v3453_v60 = vld [vmem:[#allocation4 + $0x290] ss:$8 sps:$4 sm:$0xff]   ;;  %v3476_v49 = vld [vmem:[#allocation6 + $0x24] ss:$8 sps:$4 sm:$0xff]  }
 0x241   :  { %2102 = vmatprep.subr.bf16.mxu1 %v3416_v32  ;;  %v3455_v32 = vld [vmem:[#allocation4 + $0x294] ss:$8 sps:$4 sm:$0xff]  }
 0x244   :  { %2103 = vmatpush1.bf16.msra.mxu1 %v3414_v53  ;;  %v3458_v53 = vld [vmem:[#allocation4 + $0x284] ss:$8 sps:$4 sm:$0xff]  }
 0x245   :  { %2104 = vmatprep.subr.bf16.mxu1 %v3419_v4  ;;  %v4475_v4 = vpack.c.bf16 %v4232_v41, %v4219_v55  ;;  %v3471_v55 = vld [vmem:[#allocation6 + $0x30] ss:$8 sps:$4 sm:$0xff]  }
 0x246   :  { %v3477_v41 = vld [vmem:[#allocation6 + $0x10] ss:$8 sps:$4 sm:$0xff]  }
 0x247   :  { %1997 = vmatmul.mubr.bf16.gmra.mxu1 %v1356_v40  ;;  %v3480_v40 = vld [vmem:[#allocation6] ss:$8 sps:$4 sm:$0xff]  }
 0x248   :  { %2105 = vmatpush1.bf16.msra.mxu1 %v3417_v22  ;;  %2006 = vmatprep.mubr.bf16.mxu1 %v4170_v0  ;;  %v3432_v0 = vld [vmem:[#allocation4 + $0x200] ss:$8 sps:$4 sm:$0xff]   ;;  %v3482_v22 = vld [vmem:[#allocation6 + $0x4] ss:$8 sps:$4 sm:$0xff]  }
 0x249   :  { %2106 = vmatprep.subr.bf16.mxu1 %v3422_v14  ;;  %v3485_v14 = vld [vmem:[#allocation6 + $0xf4] ss:$8 sps:$4 sm:$0xff]  }
 0x24c   :  { %2107 = vmatpush1.bf16.msra.mxu1 %v3420_v10  ;;  %v3483_v10 = vld [vmem:[#allocation6 + $0xf0] ss:$8 sps:$4 sm:$0xff]  }
 0x24d   :  { %2108 = vmatprep.subr.bf16.mxu1 %v3425_v39  ;;  %v3488_v39 = vld [vmem:[#allocation6 + $0xe4] ss:$8 sps:$4 sm:$0xff]  }
 0x24f   :  { %2007 = vmatmul.mubr.bf16.gmra.mxu1 %v4172_v6  ;;  %v3435_v6 = vld [vmem:[#allocation4 + $0x2f0] ss:$8 sps:$4 sm:$0xff]  }
 0x250   :  { %2109 = vmatpush1.bf16.msra.mxu1 %v3423_v13  ;;  %2016 = vmatprep.mubr.bf16.mxu1 %v4201_v30  ;;  %v3438_v30 = vld [vmem:[#allocation4 + $0x2e0] ss:$8 sps:$4 sm:$0xff]  }
 0x251   :  { %2110 = vmatprep.subr.bf16.mxu1 %v3428_v61  ;;  %v3486_v13 = vld [vmem:[#allocation6 + $0xe0] ss:$8 sps:$4 sm:$0xff]   ;;  %v3491_v61 = vld [vmem:[#allocation6 + $0xd4] ss:$8 sps:$4 sm:$0xff]  }
 0x254   :  { %2111 = vmatpush1.bf16.msra.mxu1 %v3426_v21  ;;  %v3489_v21 = vld [vmem:[#allocation6 + $0xd0] ss:$8 sps:$4 sm:$0xff]  }
 0x255   :  { %2112 = vmatprep.subr.bf16.mxu1 %v3431_v2  ;;  %v3494_v2 = vld [vmem:[#allocation6 + $0xc4] ss:$8 sps:$4 sm:$0xff]  }
 0x257   :  { %2017 = vmatmul.mubr.bf16.gmra.mxu1 %v4203_v18  ;;  %v3444_v18 = vld [vmem:[#allocation4 + $0x2c0] ss:$8 sps:$4 sm:$0xff]  }
 0x258   :  { %2113 = vmatpush1.bf16.msra.mxu1 %v3429_v27  ;;  %2132 = vmatprep.mubr.bf16.mxu1 %v4242_v52  ;;  %v3447_v52 = vld [vmem:[#allocation4 + $0x2b0] ss:$8 sps:$4 sm:$0xff]   ;;  %v3492_v27 = vld [vmem:[#allocation6 + $0xc0] ss:$8 sps:$4 sm:$0xff]  }
 0x259   :  { %2114 = vmatprep.subr.bf16.mxu1 %v3434_v54  ;;  %v3497_v54 = vld [vmem:[#allocation6 + $0xb4] ss:$8 sps:$4 sm:$0xff]  }
 0x25c   :  { %2115 = vmatpush1.bf16.msra.mxu1 %v3432_v0  ;;  %v3495_v0 = vld [vmem:[#allocation6 + $0xb0] ss:$8 sps:$4 sm:$0xff]  }
 0x25d   :  { %2116 = vmatprep.subr.bf16.mxu1 %v3437_v31  ;;  %v3500_v31 = vld [vmem:[#allocation6 + $0xa4] ss:$8 sps:$4 sm:$0xff]  }
 0x260   :  { %2117 = vmatpush2.bf16.msra.mxu1 %v3435_v6  ;;  %v3498_v6 = vld [vmem:[#allocation6 + $0xa0] ss:$8 sps:$4 sm:$0xff]  }
 0x261   :  { %2118 = vmatprep.subr.bf16.mxu1 %v3440_v19  ;;  %v3503_v19 = vld [vmem:[#allocation6 + $0x94] ss:$8 sps:$4 sm:$0xff]  }
 0x264   :  { %2119 = vmatpush2.bf16.msra.mxu1 %v3438_v30  ;;  %v3501_v30 = vld [vmem:[#allocation6 + $0x90] ss:$8 sps:$4 sm:$0xff]  }
 0x265   :  { %2120 = vmatprep.subr.bf16.mxu1 %v3443_v51  ;;  %v3506_v51 = vld [vmem:[#allocation6 + $0x84] ss:$8 sps:$4 sm:$0xff]  }
 0x268   :  { %2121 = vmatpush2.bf16.msra.mxu1 %v3441_v3  ;;  %v3504_v3 = vld [vmem:[#allocation6 + $0x80] ss:$8 sps:$4 sm:$0xff]  }
 0x269   :  { %2122 = vmatprep.subr.bf16.mxu1 %v3446_v44  ;;  %v3507_v44 = vld [vmem:[%s4443_s8 + $0x78] sm:$0xff]  }
 0x26c   :  { %2123 = vmatpush2.bf16.msra.mxu1 %v3444_v18  ;;  %v3508_v18 = vld [vmem:[%s4443_s8 + $0x38] sm:$0xff]  }
 0x26d   :  { %2124 = vmatprep.subr.bf16.mxu1 %v3449_v9  ;;  %v3509_v9 = vld [vmem:[%s4443_s8 + $0x70] sm:$0xff]  }
 0x270   :  { %2125 = vmatpush2.bf16.msra.mxu1 %v3447_v52  ;;  %v3510_v52 = vld [vmem:[%s4443_s8 + $0x30] sm:$0xff]  }
 0x271   :  { %2126 = vmatprep.subr.bf16.mxu1 %v3452_v38  ;;  %v3511_v38 = vld [vmem:[%s4443_s8 + $0x68] sm:$0xff]  }
 0x274   :  { %2127 = vmatpush2.bf16.msra.mxu1 %v3450_v47 }
 0x275   :  { %2128 = vmatprep.subr.bf16.mxu1 %v3455_v32 }
 0x278   :  { %2129 = vmatpush2.bf16.msra.mxu1 %v3453_v60 }
 0x279   :  { %2130 = vmatprep.subr.bf16.mxu1 %v3458_v53 }
 0x27c   :  { %2131 = vmatpush2.bf16.msra.mxu1 %v3456_v48 }
 0x27d   :  { %3080 = vmatprep.subr.bf16.mxu1 %v3507_v44 }
 0x27f   :  { %2133 = vmatmul.mubr.bf16.vlgmr.msra.gmra.mxu1 %v4244_v37  ;;  %v3459_v37 = vld [vmem:[#allocation6 + $0x70] ss:$8 sps:$4 sm:$0xff]  }
 0x280   :  { %2142 = vmatprep.mubr.bf16.mxu1 %v4250_v24  ;;  %v3461_v24 = vld [vmem:[#allocation6 + $0x74] ss:$8 sps:$4 sm:$0xff]   ;;  %3081 = vmatpush3.bf16.msra.mxu1 %v3508_v18 }
 0x281   :  { %2409 = vmatprep.subr.bf16.mxu0 %v3461_v24  ;;  %3082 = vmatprep.subr.bf16.mxu1 %v3509_v9 }
 0x282   :  { %2410 = vmatpush1.bf16.msra.mxu0 %v3459_v37 }
 0x283   :  { %2411 = vmatprep.subr.bf16.mxu0 %v3464_v59 }
 0x284   :  { %3083 = vmatpush3.bf16.msra.mxu1 %v3510_v52 }
 0x285   :  { %3084 = vmatprep.subr.bf16.mxu1 %v3511_v38 }
 0x287   :  { %2143 = vmatmul.mubr.bf16.gmra.mxu1 %v4252_v15  ;;  %v3462_v15 = vld [vmem:[#allocation6 + $0x60] ss:$8 sps:$4 sm:$0xff]  }
 0x288   :  { %2152 = vmatprep.mubr.bf16.mxu1 %v1363_v33  ;;  %2412 = vmatpush1.bf16.msra.mxu0 %v3462_v15  ;;  %v3474_v33 = vld [vmem:[#allocation6 + $0x20] ss:$8 sps:$4 sm:$0xff]  }
 0x289   :  { %2413 = vmatprep.subr.bf16.mxu0 %v3467_v36 }
 0x28c   :  { %2414 = vmatpush1.bf16.msra.mxu0 %v3465_v57 }
 0x28d   :  { %2415 = vmatprep.subr.bf16.mxu0 %v3470_v17 }
 0x28f   :  { %2153 = vmatmul.mubr.bf16.gmra.mxu1 %v1362_v23  ;;  %v3473_v23 = vld [vmem:[#allocation6 + $0x34] ss:$8 sps:$4 sm:$0xff]  }
 0x290   :  { %2162 = vmatprep.mubr.bf16.mxu1 %v4475_v4  ;;  %2416 = vmatpush1.bf16.msra.mxu0 %v3468_v20 }
 0x291   :  { %2417 = vmatprep.subr.bf16.mxu0 %v3473_v23 }
 0x294   :  { %2418 = vmatpush1.bf16.msra.mxu0 %v3471_v55 }
 0x295   :  { %2419 = vmatprep.subr.bf16.mxu0 %v3476_v49 }
 0x297   :  { %2163 = vmatmul.mubr.bf16.gmra.mxu1 %v4476_v63 }
 0x298   :  { %2420 = vmatpush1.bf16.msra.mxu0 %v3474_v33 }
 0x299   :  { %2421 = vmatprep.subr.bf16.mxu0 %v3479_v34 }
 0x29c   :  { %2422 = vmatpush1.bf16.msra.mxu0 %v3477_v41 }
 0x29d   :  { %2423 = vmatprep.subr.bf16.mxu0 %v3482_v22 }
 0x2a0   :  { %2424 = vmatpush1.bf16.msra.mxu0 %v3480_v40 }
 0x2a1   :  { %2425 = vmatprep.subr.bf16.mxu0 %v3485_v14 }
 0x2a4   :  { %2426 = vmatpush2.bf16.msra.mxu0 %v3483_v10 }
 0x2a5   :  { %2427 = vmatprep.subr.bf16.mxu0 %v3488_v39 }
 0x2a8   :  { %2428 = vmatpush2.bf16.msra.mxu0 %v3486_v13 }
 0x2a9   :  { %2429 = vmatprep.subr.bf16.mxu0 %v3491_v61 }
 0x2ac   :  { %2430 = vmatpush2.bf16.msra.mxu0 %v3489_v21 }
 0x2ad   :  { %2431 = vmatprep.subr.bf16.mxu0 %v3494_v2  ;;  %v1462_v2 = vld [vmem:[%s4441_s6] sm:$0x3] }
 0x2b0   :  { %2432 = vmatpush2.bf16.msra.mxu0 %v3492_v27  ;;  %v1471_v27 = vrot.slane %v1462_v2, %v3888_v28 }
 0x2b1   :  { %2433 = vmatprep.subr.bf16.mxu0 %v3497_v54 }
 0x2b4   :  { %2434 = vmatpush2.bf16.msra.mxu0 %v3495_v0 }
 0x2b5   :  { %2435 = vmatprep.subr.bf16.mxu0 %v3500_v31 }
 0x2b8   :  { %2436 = vmatpush2.bf16.msra.mxu0 %v3498_v6  ;;  %v1467_v6 = vrot.slane %v1462_v2, %v3882_v26 }
 0x2b9   :  { %2437 = vmatprep.subr.bf16.mxu0 %v3503_v19 }
 0x2bc   :  { %2438 = vmatpush2.bf16.msra.mxu0 %v3501_v30 }
 0x2bd   :  { %2439 = vmatprep.subr.bf16.mxu0 %v3506_v51 }
 0x2c0   :  { %2440 = vmatpush2.bf16.msra.mxu0 %v3504_v3 }
 0x2e2   :  { %v2061_v24 = vpop.f32.mrf.mxu0 }
 0x2e4   :  { %v2063_v15 = vpop.f32.mrf.mxu0 }
 0x2e6   :  { %v2065_v57 = vpop.f32.mrf.mxu0 }
 0x2e8   :  { %v2067_v20 = vpop.f32.mrf.mxu0 }
 0x2ea   :  { %v2071_v55 = vpop.f32.mrf.mxu0 }
 0x2ec   :  { %v2073_v33 = vpop.f32.mrf.mxu0 }
 0x2ee   :  { %v2075_v41 = vpop.f32.mrf.mxu0 }
 0x2f0   :  { %v2077_v40 = vpop.f32.mrf.mxu0 }
 0x2f2   :  { %v2081_v10 = vpop.f32.mrf.mxu0 }
 0x2f4   :  { %v2083_v61 = vpop.f32.mrf.mxu0 }
 0x2f6   :  { %v2085_v0 = vpop.f32.mrf.mxu0 }
 0x2f8   :  { %v2087_v3 = vpop.f32.mrf.mxu0 }
 0x2fa   :  { %v2091_v25 = vpop.f32.mrf.mxu0 }
 0x2ff   :  { %v1988_v47 = vpop.f32.mrf.mxu1 }
 0x300   :  { %v1989_v52 = vadd.f32 %v1988_v47, %v1467_v6 }
 0x301   :  { %v1990_v32 = vpop.f32.mrf.mxu1 }
 0x302   :  { %v1991_v19 = vadd.f32 %v1990_v32, %v1471_v27  ;;  %v2062_v11 = vadd.f32 %v2061_v24, %v1989_v52 }
 0x303   :  { %v1992_v60 = vpop.f32.mrf.mxu1 }
 0x304   :  { %v1993_v51 = vadd.f32 %v1992_v60, %v1467_v6  ;;  %v2064_v62 = vadd.f32 %v2063_v15, %v1991_v19 }
 0x305   :  { %v1994_v53 = vpop.f32.mrf.mxu1 }
 0x306   :  { %v1995_v44 = vadd.f32 %v1994_v53, %v1471_v27  ;;  %v2066_v29 = vadd.f32 %v2065_v57, %v1993_v51  ;;  %v2093_v57 = vpop.f32.mrf.mxu0 }
 0x307   :  { %v1998_v48 = vpop.f32.mrf.mxu1 }
 0x308   :  { %v1999_v58 = vadd.f32 %v1998_v48, %v1467_v6  ;;  %v2068_v35 = vadd.f32 %v2067_v20, %v1995_v44 }
 0x309   :  { %v2000_v4 = vpop.f32.mrf.mxu1 }
 0x30a   :  { %v2001_v7 = vadd.f32 %v2000_v4, %v1471_v27  ;;  %v2072_v19 = vadd.f32 %v2071_v55, %v1999_v58  ;;  %v2095_v55 = vpop.f32.mrf.mxu0 }
 0x30b   :  { %v2002_v63 = vpop.f32.mrf.mxu1 }
 0x30c   :  { %v2003_v53 = vadd.f32 %v2002_v63, %v1467_v6  ;;  %v2074_v20 = vadd.f32 %v2073_v33, %v2001_v7 }
 0x30d   :  { %v2004_v37 = vpop.f32.mrf.mxu1 }
 0x30e   :  { %v2076_v63 = vadd.f32 %v2075_v41, %v2003_v53 }
 0x30f   :  { %v2008_v59 = vpop.f32.mrf.mxu1 }
 0x310   :  { %v2009_v18 = vadd.f32 %v2008_v59, %v1467_v6  ;;  %v2005_v59 = vadd.f32 %v2004_v37, %v1471_v27 }
 0x311   :  { %v2010_v36 = vpop.f32.mrf.mxu1 }
 0x312   :  { %v2011_v38 = vadd.f32 %v2010_v36, %v1471_v27  ;;  %v2082_v26 = vadd.f32 %v2081_v10, %v2009_v18  ;;  %v2078_v37 = vadd.f32 %v2077_v40, %v2005_v59  ;;  %v2097_v18 = vpop.f32.mrf.mxu0 }
 0x313   :  { %v2012_v17 = vpop.f32.mrf.mxu1 }
 0x314   :  { %v2013_v28 = vadd.f32 %v2012_v17, %v1467_v6  ;;  %v2084_v8 = vadd.f32 %v2083_v61, %v2011_v38 }
 0x315   :  { %v2014_v23 = vpop.f32.mrf.mxu1 }
 0x316   :  { %v2015_v2 = vadd.f32 %v2014_v23, %v1471_v27  ;;  %v2086_v17 = vadd.f32 %v2085_v0, %v2013_v28 }
 0x317   :  { %v2018_v49 = vpop.f32.mrf.mxu1 }
 0x318   :  { %v2019_v15 = vadd.f32 %v2018_v49, %v1467_v6 }
 0x319   :  { %v2020_v34 = vpop.f32.mrf.mxu1 }
 0x31a   :  { %v2021_v51 = vadd.f32 %v2020_v34, %v1471_v27 }
 0x31b   :  { %v2022_v22 = vpop.f32.mrf.mxu1 }
 0x31c   :  { %v2094_v33 = vadd.f32 %v2093_v57, %v2021_v51  ;;  %v4480_v57 = vld [vmem:[#allocation13_spill] sm:$0xff] }
 0x31d   :  { %v4309_v14 = vpop.f32.mrf.mxu1 }
 0x31e   :  { %v2025_v34 = vadd.f32 %v4309_v14, %v1471_v27 }
 0x33f   :  { %v2134_v39 = vpop.f32.mrf.mxu1 }
 0x340   :  { %v2135_v4 = vadd.f32 %v2134_v39, %v2062_v11 }
 0x341   :  { %v2136_v13 = vpop.f32.mrf.mxu1 }
 0x342   :  { %v2137_v12 = vadd.f32 %v2136_v13, %v2064_v62  ;;  %v2173_v11 = vmax.f32 %v2135_v4, 0.0  ;;  %v4481_v4 = vld [vmem:[#allocation18_spill] sm:$0xff] }
 0x343   :  { %v2138_v21 = vpop.f32.mrf.mxu1 }
 0x344   :  { %v2139_v60 = vadd.f32 %v2138_v21, %v2066_v29  ;;  %v2174_v62 = vmax.f32 %v2137_v12, 0.0  ;;  %v2088_v29 = vadd.f32 %v2087_v3, %v2015_v2 }
 0x345   :  { %v2140_v54 = vpop.f32.mrf.mxu1 }
 0x346   :  { %v2175_v13 = vmax.f32 %v2139_v60, 0.0  ;;  %v2190_v7 = vadd.f32 %v2174_v62, %v3894_v45 }
 0x347   :  { %v4315_v31 = vpop.f32.mrf.mxu1 }
 0x348   :  { %4477 = vst [vmem:[#allocation22_spill] sm:$0xff] %v4315_v31  ;;  %v2141_v31 = vadd.f32 %v2140_v54, %v2068_v35  ;;  %v2023_v54 = vadd.f32 %v2022_v22, %v1467_v6  ;;  %v2191_v39 = vadd.f32 %v2175_v13, %v3896_v46  ;;  %v2189_v46 = vadd.f32 %v2173_v11, %v3892_v42  ;;  %v4483_v13 = vld [vmem:[#allocation11_spill] sm:$0xff]  ;;  %v3513_v11 = vld [vmem:[%s4443_s8 + $0x60] sm:$0xff]  }
 0x349   :  { %v4318_v30 = vpop.f32.mrf.mxu1 }
 0x34a   :  { %v2176_v61 = vmax.f32 %v2141_v31, 0.0  ;;  %v2147_v14 = vadd.f32 %v4318_v30, %v2074_v20  ;;  %v2096_v38 = vadd.f32 %v2095_v55, %v2023_v54  ;;  %v4482_v20 = vld [vmem:[#allocation14_spill] sm:$0xff] }
 0x34b   :  { %v2148_v9 = vpop.f32.mrf.mxu1 }
 0x34c   :  { %v2192_v22 = vadd.f32 %v2176_v61, %v3898_v50  ;;  %v2149_v31 = vadd.f32 %v2148_v9, %v2076_v63  ;;  %v2178_v53 = vmax.f32 %v2147_v14, 0.0  ;;  %v4485_v61 = vld [vmem:[#allocation16_spill] sm:$0xff] }
 0x34d   :  { %v2150_v43 = vpop.f32.mrf.mxu1 }
 0x34e   :  { %v2151_v27 = vadd.f32 %v2150_v43, %v2078_v37  ;;  %v4486_v37 = vld [vmem:[#allocation10_spill] sm:$0xff] }
 0x34f   :  { %v2154_v32 = vpop.f32.mrf.mxu1 }
 0x350   :  { %v2155_v47 = vadd.f32 %v2154_v32, %v2082_v26  ;;  %v2179_v32 = vmax.f32 %v2149_v31, 0.0  ;;  %v3522_v31 = vld [vmem:[%s4443_s8] sm:$0xff]  }
 0x351   :  { %v2156_v36 = vpop.f32.mrf.mxu1 }
 0x352   :  { %v2157_v48 = vadd.f32 %v2156_v36, %v2084_v8  ;;  %v2181_v35 = vmax.f32 %v2155_v47, 0.0  ;;  %v2092_v8 = vadd.f32 %v2091_v25, %v2019_v15  ;;  %v2195_v51 = vadd.f32 %v2179_v32, %v4480_v57 }
 0x353   :  { %v2158_v10 = vpop.f32.mrf.mxu1 }
 0x354   :  { %v2182_v23 = vmax.f32 %v2157_v48, 0.0  ;;  %v2159_v24 = vadd.f32 %v2158_v10, %v2086_v17  ;;  %v2197_v25 = vadd.f32 %v2181_v35, %v3901_v56  ;;  %v2098_v56 = vadd.f32 %v2097_v18, %v2025_v34  ;;  %v3512_v34 = vld [vmem:[%s4443_s8 + $0x28] sm:$0xff]  }
 0x355   :  { %v2160_v21 = vpop.f32.mrf.mxu1  ;;  %3085 = vmatpush3.bf16.msra.mxu1 %v3512_v34 }
 0x356   :  { %v2183_v49 = vmax.f32 %v2159_v24, 0.0  ;;  %v2161_v58 = vadd.f32 %v2160_v21, %v2088_v29  ;;  %v2198_v0 = vadd.f32 %v2182_v23, %v3912_v1  ;;  %v4478_v1 = vld [vmem:[#allocation22_spill] sm:$0xff]  ;;  %v2205_v2 = vmax.f32 %v2189_v46, %v2197_v25  ;;  %v4484_v24 = vld [vmem:[#allocation15_spill] sm:$0xff]  ;;  %3086 = vmatprep.subr.bf16.mxu1 %v3513_v11  ;;  %v3523_v25 = vld [vmem:[%s4443_s8 + $0xb8] sm:$0xff]  }
 0x357   :  { %v2164_v12 = vpop.f32.mrf.mxu1  ;;  %v2145_v52 = vadd.f32 %v4478_v1, %v2072_v19  ;;  %v4479_v19 = vld [vmem:[#allocation12_spill] sm:$0xff]  ;;  %v2194_v23 = vadd.f32 %v2178_v53, %v4483_v13  ;;  %v3526_v13 = vld [vmem:[%s4443_s8 + $0xa0] sm:$0xff]  }
 0x358   :  { %v2199_v41 = vadd.f32 %v2183_v49, %v3933_v16  ;;  %v2184_v40 = vmax.f32 %v2161_v58, 0.0  ;;  %v2165_v6 = vadd.f32 %v2164_v12, %v2092_v8  ;;  %v2206_v50 = vmax.f32 %v2190_v7, %v2198_v0  ;;  %v3514_v7 = vld [vmem:[%s4443_s8 + $0x20] sm:$0xff]   ;;  %v3515_v12 = vld [vmem:[%s4443_s8 + $0x58] sm:$0xff]   ;;  %v3518_v0 = vld [vmem:[%s4443_s8 + $0x10] sm:$0xff]  }
 0x359   :  { %v2166_v3 = vpop.f32.mrf.mxu1  ;;  %v2177_v36 = vmax.f32 %v2145_v52, 0.0  ;;  %3087 = vmatpush3.bf16.msra.mxu1 %v3514_v7 }
 0x35a   :  { %v2200_v45 = vadd.f32 %v2184_v40, %v3918_v5  ;;  %v2167_v44 = vadd.f32 %v2166_v3, %v2094_v33  ;;  %v2207_v16 = vmax.f32 %v2191_v39, %v2199_v41  ;;  %v2185_v60 = vmax.f32 %v2165_v6, 0.0  ;;  %v3516_v33 = vld [vmem:[%s4443_s8 + $0x18] sm:$0xff]   ;;  %3088 = vmatprep.subr.bf16.mxu1 %v3515_v12  ;;  %v3517_v39 = vld [vmem:[%s4443_s8 + $0x50] sm:$0xff]   ;;  %v3519_v41 = vld [vmem:[%s4443_s8 + $0x48] sm:$0xff]  }
 0x35b   :  { %v2168_v28 = vpop.f32.mrf.mxu1  ;;  %v2180_v5 = vmax.f32 %v2151_v27, 0.0  ;;  %v2193_v35 = vadd.f32 %v2177_v36, %v4486_v37  ;;  %v3520_v40 = vld [vmem:[%s4443_s8 + $0x8] sm:$0xff]   ;;  %v3530_v37 = vld [vmem:[%s4443_s8 + $0x80] sm:$0xff]  }
 0x35c   :  { %v2208_v9 = vmax.f32 %v2192_v22, %v2200_v45  ;;  %v2186_v26 = vmax.f32 %v2167_v44, 0.0  ;;  %v2169_v30 = vadd.f32 %v2168_v28, %v2096_v38  ;;  %v2213_v42 = vpack.c.bf16 %v2207_v16, %v2205_v2  ;;  %v3521_v22 = vld [vmem:[%s4443_s8 + $0x40] sm:$0xff]  }
 0x35d   :  { %v2170_v43 = vpop.f32.mrf.mxu1  ;;  %v2201_v62 = vadd.f32 %v2185_v60, %v4481_v4  ;;  %v2196_v29 = vadd.f32 %v2180_v5, %v4484_v24  ;;  %3089 = vmatpush3.bf16.msra.mxu1 %v3516_v33  ;;  %v4488_v60 = vld [vmem:[#allocation17_spill] sm:$0xff]  ;;  %v4490_v4 = vld [vmem:[#allocation19_spill] sm:$0xff]  ;;  %v3527_v24 = vld [vmem:[%s4443_s8 + $0x98] sm:$0xff]  }
 0x35e   :  { %v2171_v59 = vadd.f32 %v2170_v43, %v2098_v56  ;;  %v2214_v47 = vpack.c.bf16 %v2208_v9, %v2206_v50  ;;  %v2187_v15 = vmax.f32 %v2169_v30, 0.0  ;;  %v2202_v48 = vadd.f32 %v2186_v26, %v4479_v19  ;;  %3090 = vmatprep.subr.bf16.mxu1 %v3517_v39  ;;  %v3525_v19 = vld [vmem:[%s4443_s8 + $0xa8] sm:$0xff]  }
 0x35f   :  { %v2209_v58 = vmax.f32 %v2193_v35, %v2201_v62 }
 0x360   :  { %v2188_v17 = vmax.f32 %v2171_v59, 0.0  ;;  %2441 = vmatprep.mubr.bf16.mxu0 %v2214_v47  ;;  %v2203_v10 = vadd.f32 %v2187_v15, %v4482_v20  ;;  %v2210_v54 = vmax.f32 %v2194_v23, %v2202_v48  ;;  %v3524_v47 = vld [vmem:[%s4443_s8 + $0xb0] sm:$0xff]  }
 0x361   :  { %2442 = vmatmul.mubr.bf16.vlgmr.msra.gmra.mxu0 %v2213_v42  ;;  %3091 = vmatpush3.bf16.msra.mxu1 %v3518_v0 }
 0x362   :  { %v2204_v63 = vadd.f32 %v2188_v17, %v4485_v61  ;;  %v2211_v21 = vmax.f32 %v2195_v51, %v2203_v10  ;;  %3092 = vmatprep.subr.bf16.mxu1 %v3519_v41  ;;  %v4489_v17 = vld [vmem:[#allocation20_spill] sm:$0xff]  ;;  %v3529_v61 = vld [vmem:[%s4443_s8 + $0x88] sm:$0xff]  }
 0x364   :  { %v2212_v49 = vmax.f32 %v2196_v29, %v2204_v63  ;;  %v2215_v55 = vpack.c.bf16 %v2211_v21, %v2209_v58  ;;  %v3528_v29 = vld [vmem:[%s4443_s8 + $0x90] sm:$0xff]   ;;  %v4491_v21 = vld [vmem:[#allocation21_spill] sm:$0xff] }
 0x365   :  { %3093 = vmatpush3.bf16.msra.mxu1 %v3520_v40  ;;  %v3055_v40 = vld [vmem:[%s4444_s9] ss:$0 sm:$0xff] }
 0x366   :  { %v2216_v8 = vpack.c.bf16 %v2212_v49, %v2210_v54  ;;  %3094 = vmatprep.subr.bf16.mxu1 %v3521_v22 }
 0x368   :  { %2451 = vmatprep.mubr.bf16.mxu0 %v2216_v8 }
 0x369   :  { %2452 = vmatmul.mubr.bf16.gmra.mxu0 %v2215_v55  ;;  %3095 = vmatpush3.bf16.msra.mxu1 %v3522_v31 }
 0x36a   :  { %3118 = vmatprep.subr.bf16.mxu1 %v3523_v25 }
 0x421   :  { %v2443_v6 = vpop.f32.mrf.mxu0 }
 0x423   :  { %v2445_v3 = vpop.f32.mrf.mxu0 }
 0x424   :  { %v2462_v45 = vmax.f32 %v2443_v6, %v2445_v3 }
 0x425   :  { %v2447_v14 = vpop.f32.mrf.mxu0 }
 0x426   :  { %v2466_v50 = vrot.slane %v2462_v45, 7  ;;  %v2478_v51 = vrot.slane %v2462_v45, 1 }
 0x427   :  { %v2449_v27 = vpop.f32.mrf.mxu0 }
 0x428   :  { %v2463_v44 = vmax.f32 %v2447_v14, %v2449_v27 }
 0x429   :  { %v2453_v18 = vpop.f32.mrf.mxu0 }
 0x42a   :  { %v2491_v46 = vpack.c.bf16 %v2463_v44, %v2462_v45  ;;  %v2467_v9 = vrot.slane %v2463_v44, 7  ;;  %v2479_v5 = vrot.slane %v2463_v44, 1 }
 0x42b   :  { %v2455_v1 = vpop.f32.mrf.mxu0 }
 0x42c   :  { %2727 = vmatprep.mubr.bf16.mxu1 %v2491_v46  ;;  %v2464_v28 = vmax.f32 %v2453_v18, %v2455_v1  ;;  %v2472_v43 = vsel %vm421_vm2, %v2466_v50, %v2467_v9  ;;  %v2484_v10 = vsel %vm446_vm5, %v2478_v51, %v2479_v5 }
 0x42d   :  { %v2457_v52 = vpop.f32.mrf.mxu0 }
 0x42e   :  { %v2480_v2 = vrot.slane %v2464_v28, 1  ;;  %v2468_v53 = vrot.slane %v2464_v28, 7 }
 0x42f   :  { %v2459_v16 = vpop.f32.mrf.mxu0 }
 0x430   :  { %v2465_v38 = vmax.f32 %v2457_v52, %v2459_v16  ;;  %v2483_v42 = vsel %vm446_vm5, %v2479_v5, %v2480_v2  ;;  %v2471_v15 = vsel %vm421_vm2, %v2467_v9, %v2468_v53 }
 0x431   :  { %v2487_v57 = vmul.f32 %v4489_v17, %v2483_v42  ;;  %v2476_v62 = vmul.f32 %v4490_v4, %v2471_v15 }
 0x432   :  { %v2469_v26 = vrot.slane %v2465_v38, 7  ;;  %v2494_v36 = vpack.c.bf16 %v2465_v38, %v2464_v28  ;;  %v2481_v63 = vrot.slane %v2465_v38, 1 }
 0x433   :  { %v2492_v23 = vpack.c.bf16 %v2487_v57, %v2484_v10 }
 0x434   :  { %v2473_v32 = vsel %vm421_vm2, %v2469_v26, %v2466_v50  ;;  %v2470_v48 = vsel %vm421_vm2, %v2468_v53, %v2469_v26  ;;  %v2485_v35 = vsel %vm446_vm5, %v2481_v63, %v2478_v51  ;;  %v2482_v49 = vsel %vm446_vm5, %v2480_v2, %v2481_v63 }
 0x435   :  { %v2474_v30 = vmul.f32 %v4488_v60, %v2473_v32  ;;  %v2493_v20 = vpack.c.bf16 %v2470_v48, %v2476_v62  ;;  %v2489_v54 = vmul.f32 %v4491_v21, %v2485_v35 }
 0x437   :  { %v2490_v59 = vpack.c.bf16 %v2472_v43, %v2474_v30  ;;  %v2495_v58 = vpack.c.bf16 %v2489_v54, %v2482_v49 }
 0x439   :  { %2728 = vmatmul.mubr.bf16.vlgmr.msra.gmra.mxu1 %v2490_v59 }
 0x43a   :  { %3119 = vmatpush3.bf16.msra.mxu1 %v3523_v25  ;;  %2735 = vmatprep.mubr.bf16.mxu1 %v2494_v36 }
 0x43b   :  { %3120 = vmatprep.subr.bf16.mxu1 %v3524_v47 }
 0x43e   :  { %3121 = vmatpush3.bf16.msra.mxu1 %v3524_v47 }
 0x43f   :  { %3122 = vmatprep.subr.bf16.mxu1 %v3525_v19 }
 0x441   :  { %2736 = vmatmul.mubr.bf16.gmra.mxu1 %v2493_v20 }
 0x442   :  { %3123 = vmatpush3.bf16.msra.mxu1 %v3525_v19  ;;  %3134 = vmatprep.mubr.bf16.mxu1 %v2492_v23 }
 0x443   :  { %3124 = vmatprep.subr.bf16.mxu1 %v3526_v13 }
 0x446   :  { %3125 = vmatpush3.bf16.msra.mxu1 %v3526_v13 }
 0x447   :  { %3126 = vmatprep.subr.bf16.mxu1 %v3527_v24 }
 0x44a   :  { %3127 = vmatpush3.bf16.msra.mxu1 %v3527_v24 }
 0x44b   :  { %3128 = vmatprep.subr.bf16.mxu1 %v3528_v29 }
 0x44e   :  { %3129 = vmatpush3.bf16.msra.mxu1 %v3528_v29 }
 0x44f   :  { %3130 = vmatprep.subr.bf16.mxu1 %v3529_v61 }
 0x452   :  { %3131 = vmatpush3.bf16.msra.mxu1 %v3529_v61 }
 0x453   :  { %3132 = vmatprep.subr.bf16.mxu1 %v3530_v37 }
 0x456   :  { %3133 = vmatpush3.bf16.msra.mxu1 %v3530_v37 }
 0x459   :  { %3135 = vmatmul.mubr.bf16.vlgmr.msra.gmra.mxu1 %v2495_v58 }
 0x4f9   :  { %v3096_v8 = vpop.f32.mrf.mxu1 }
 0x4fb   :  { %v3097_v55 = vpop.f32.mrf.mxu1 }
 0x4fc   :  { %v3098_v41 = vadd.f32 %v3097_v55, %v3096_v8 }
 0x4fd   :  { %v3099_v34 = vpop.f32.mrf.mxu1 }
 0x4fe   :  { %v2730_v14 = vadd.f32 %v3098_v41, %v3055_v40 }
 0x4ff   :  { %v3100_v11 = vpop.f32.mrf.mxu1 }
 0x500   :  { %v3101_v6 = vadd.f32 %v3100_v11, %v3099_v34 }
 0x501   :  { %v3102_v7 = vpop.f32.mrf.mxu1 }
 0x502   :  { %v2733_v16 = vadd.f32 %v3101_v6, %v3055_v40 }
 0x503   :  { %v3103_v12 = vpop.f32.mrf.mxu1 }
 0x504   :  { %v3104_v39 = vadd.f32 %v3103_v12, %v3102_v7 }
 0x505   :  { %v3105_v33 = vpop.f32.mrf.mxu1 }
 0x506   :  { %v2738_v31 = vadd.f32 %v3104_v39, %v3055_v40 }
 0x507   :  { %v3106_v0 = vpop.f32.mrf.mxu1 }
 0x508   :  { %v3107_v22 = vadd.f32 %v3106_v0, %v3105_v33 }
 0x50a   :  { %v2741_v18 = vadd.f32 %v3107_v22, %v3055_v40 }
 0x519   :  { %v3136_v25 = vpop.f32.mrf.mxu1 }
 0x51a   :  { %v2787_v3 = vadd.f32 %v3136_v25, %v2738_v31 }
 0x51b   :  { %v2778_v27 = vpop.f32.mrf.mxu1 }
 0x51c   :  { %v2795_v45 = vmax.f32 %v2787_v3, 0.0  ;;  %v2779_v44 = vadd.f32 %v2778_v27, %v2730_v14 }
 0x51d   :  { %v3137_v46 = vpop.f32.mrf.mxu1 }
 0x51e   :  { %2799 = vst.msk [vmem:[%s4445_s10 + $0x10] sm:$0xff] %vm256_vm0, %v2795_v45  ;;  %v2793_v1 = vmax.f32 %v2779_v44, 0.0  ;;  %v2790_v52 = vadd.f32 %v3137_v46, %v2741_v18 }
 0x51f   :  { %v2781_v38 = vpop.f32.mrf.mxu1 }
 0x520   :  { %2797 = vst.msk [vmem:[%s4445_s10] sm:$0xff] %vm256_vm0, %v2793_v1  ;;  %v2796_v28 = vmax.f32 %v2790_v52, 0.0  ;;  %v2782_v50 = vadd.f32 %v2781_v38, %v2733_v16 }
 0x522   :  { %2800 = vst.msk [vmem:[%s4445_s10 + $0x18] sm:$0xff] %vm256_vm0, %v2796_v28  ;;  %v2794_v9 = vmax.f32 %v2782_v50, 0.0 }
 0x524   :  { %2798 = vst.msk [vmem:[%s4445_s10 + $0x8] sm:$0xff] %vm256_vm0, %v2794_v9 }
 0x525   :  { %2805 = vsyncpa [#allocation3], 1 }
 0x526   :  { %2806 = vsyncpa [#allocation5], 1 }

</bundles_post_ra>
